<compile_context>
chip_gen: v5e
topology: v5e:2x2
jax: 0.10.0
libtpu: 0.0.40
codegen_flags: <defaults>
</compile_context>

<pallas_src>
import functools
import math

import jax
import jax.numpy as jnp
from jax.experimental import pallas as pl
from jax.experimental.pallas import tpu as pltpu

LANE = 128          # lane width for lane-dense outputs (classifier logits padding)
LN_EPS = 1e-12      # HF ALBERT layer_norm_eps
ENC_VMEM_LIMIT = 48 * 1024 * 1024   # < v7x 64 MiB physical, > v5e/v6e default scoped limits


# ----------------------------------------------------------------------------
# Small helpers
# ----------------------------------------------------------------------------
def _round_up(x, m):
    return ((x + m - 1) // m) * m


def _tile_exact(dim, target):
    """Tile size that divides dim exactly (target if it divides, else the full dim)."""
    return target if (dim > target and dim % target == 0) else dim


def _pad_rows(x, multiple):
    """Pad rows of x with zeros up to a multiple of `multiple` (no-op if already aligned)."""
    m = x.shape[0]
    mp = _round_up(m, multiple)
    if mp == m:
        return x
    pad = jnp.zeros((mp - m,) + x.shape[1:], x.dtype)
    return jnp.concatenate([x, pad], axis=0)


def _gelu_new(x):
    # HF ALBERT "gelu_new" (tanh approximation), computed in f32.
    c = math.sqrt(2.0 / math.pi)
    return 0.5 * x * (1.0 + jnp.tanh(c * (x + 0.044715 * x * x * x)))


def _layernorm_f32(x, gamma, beta, eps):
    mean = jnp.mean(x, axis=-1, keepdims=True)
    var = jnp.mean(jnp.square(x - mean), axis=-1, keepdims=True)
    return (x - mean) * jax.lax.rsqrt(var + eps) * gamma + beta


# ----------------------------------------------------------------------------
# Generic tiled matmul (+bias, +activation) — used for the embedding projection
# ----------------------------------------------------------------------------
def _matmul_kernel(x_ref, w_ref, b_ref, o_ref, acc_ref, *, activation):
    k = pl.program_id(2)

    @pl.when(k == 0)
    def _():
        acc_ref[...] = jnp.zeros_like(acc_ref)

    acc_ref[...] += jnp.dot(x_ref[...], w_ref[...], preferred_element_type=jnp.float32)

    @pl.when(k == pl.num_programs(2) - 1)
    def _():
        y = acc_ref[...] + b_ref[...]          # f32 epilogue
        if activation == "relu":
            y = jnp.maximum(y, 0.0)
        elif activation == "tanh":
            y = jnp.tanh(y)
        elif activation == "gelu":
            y = _gelu_new(y)
        o_ref[...] = y.astype(o_ref.dtype)


def dense(x, w, b, activation="none", out_dtype=jnp.bfloat16):
    """x:[M,K], w:[K,N] bf16, b:[1,N] f32 -> [M,N] (tiled, pipelined, f32 acc).
    M is row-padded to the tile size so the grid never degenerates to one giant tile."""
    M, K = x.shape
    _, N = w.shape
    tm = min(M, 256)
    x_p = _pad_rows(x.astype(jnp.bfloat16), tm)
    Mp = x_p.shape[0]
    tn, tk = _tile_exact(N, 256), _tile_exact(K, 512)
    out = pl.pallas_call(
        functools.partial(_matmul_kernel, activation=activation),
        grid_spec=pltpu.PrefetchScalarGridSpec(
            num_scalar_prefetch=0,
            grid=(Mp // tm, N // tn, K // tk),
            in_specs=[
                pl.BlockSpec((tm, tk), lambda i, j, k: (i, k)),
                pl.BlockSpec((tk, tn), lambda i, j, k: (k, j)),
                pl.BlockSpec((1, tn), lambda i, j, k: (0, j)),
            ],
            out_specs=pl.BlockSpec((tm, tn), lambda i, j, k: (i, j)),
            scratch_shapes=[pltpu.VMEM((tm, tn), jnp.float32)],
        ),
        out_shape=jax.ShapeDtypeStruct((Mp, N), out_dtype),
        compiler_params=pltpu.CompilerParams(
            dimension_semantics=("parallel", "parallel", "arbitrary")),
    )(x_p, w, b)
    return out[:M] if Mp != M else out


# ----------------------------------------------------------------------------
# Row-tiled LayerNorm (embedding LN — no residual input; f32 in, bf16 out)
# ----------------------------------------------------------------------------
def _ln_kernel(x_ref, g_ref, b_ref, o_ref, *, eps):
    x = x_ref[...].astype(jnp.float32)
    o_ref[...] = _layernorm_f32(x, g_ref[...], b_ref[...], eps).astype(o_ref.dtype)


def layernorm(x, gamma, beta, eps=LN_EPS, out_dtype=jnp.bfloat16):
    M, N = x.shape
    tm = min(M, 512)
    x_p = _pad_rows(x, tm)
    Mp = x_p.shape[0]
    out = pl.pallas_call(
        functools.partial(_ln_kernel, eps=eps),
        grid=(Mp // tm,),
        in_specs=[pl.BlockSpec((tm, N), lambda i: (i, 0)),
                  pl.BlockSpec((1, N), lambda i: (0, 0)),
                  pl.BlockSpec((1, N), lambda i: (0, 0))],
        out_specs=pl.BlockSpec((tm, N), lambda i: (i, 0)),
        out_shape=jax.ShapeDtypeStruct((Mp, N), out_dtype),
        compiler_params=pltpu.CompilerParams(dimension_semantics=("parallel",)),
    )(x_p, gamma, beta)
    return out[:M] if Mp != M else out


# ----------------------------------------------------------------------------
# Fused shared ALBERT layer — one pallas_call, grid = (batch, num_layers)
# Only the first token (pooler input) is written back to HBM.
# ----------------------------------------------------------------------------
def _albert_layer_kernel(h0_ref, bias_ref,
                         wqkv_ref, bqkv_ref,
                         wo_ref, bo_ref, ln1_g_ref, ln1_b_ref,
                         wff_ref, bff_ref, wffo_ref, bffo_ref,
                         ln2_g_ref, ln2_b_ref,
                         o_ref, h_scr, ctx_scr,
                         *, num_heads, head_dim, eps, ffn_chunk):
    layer = pl.program_id(1)
    hidden = num_heads * head_dim

    @pl.when(layer == 0)
    def _():
        h_scr[...] = h0_ref[0]                            # [S, H] bf16

    x = h_scr[...]                                        # bf16, VMEM-resident state

    # ---- fused QKV projection: bf16 MXU, f32 acc + bias, back to bf16 for attention ----
    # (1/sqrt(head_dim) is pre-folded into the Q columns of wqkv/bqkv.)
    qkv_f32 = jnp.dot(x, wqkv_ref[...], preferred_element_type=jnp.float32) + bqkv_ref[...]
    qkv = qkv_f32.astype(jnp.bfloat16)                    # [S, 3H] bf16

    bias = bias_ref[0]                                    # [1, S] f32 additive key mask

    # One transpose of the full K block; heads sliced along the sublane axis.
    k_t = qkv[:, hidden:2 * hidden].T                     # [H, S] bf16

    # ---- per-head attention (bf16 matmuls, f32 softmax); context to scratch per head ----
    # TODO(synk): for long sequences use flash-style q/k blocking with running max/sum
    # instead of materializing the [S, S] score tile per head.
    for h in range(num_heads):
        lo = h * head_dim
        q_h = qkv[:, lo:lo + head_dim]                    # bf16 [S, dh] (pre-scaled)
        k_h_t = k_t[lo:lo + head_dim, :]                  # bf16 [dh, S]
        v_h = qkv[:, 2 * hidden + lo:2 * hidden + lo + head_dim]
        s = jnp.dot(q_h, k_h_t, preferred_element_type=jnp.float32) + bias   # f32 [S,S]
        m = jnp.max(s, axis=-1, keepdims=True)
        p = jnp.exp(s - m)
        p = p * pl.reciprocal(jnp.sum(p, axis=-1, keepdims=True), approx=True)
        pv = jnp.dot(p.astype(jnp.bfloat16), v_h, preferred_element_type=jnp.float32)
        ctx_scr[:, lo:lo + head_dim] = pv.astype(jnp.bfloat16)

    # ---- attention output projection + residual + LayerNorm (fused epilogue) ----
    attn = jnp.dot(ctx_scr[...], wo_ref[...],
                   preferred_element_type=jnp.float32) + bo_ref[...]
    h1 = _layernorm_f32(attn + x.astype(jnp.float32), ln1_g_ref[...], ln1_b_ref[...], eps)
    h1_bf = h1.astype(jnp.bfloat16)

    # ---- FFN (gelu_new), chunked over the intermediate dim; residual + LayerNorm ----
    inter = wff_ref.shape[1]
    acc = None
    for c0 in range(0, inter, ffn_chunk):
        c1 = c0 + ffn_chunk
        ff_c = jnp.dot(h1_bf, wff_ref[:, c0:c1],
                       preferred_element_type=jnp.float32) + bff_ref[:, c0:c1]
        ff_c = _gelu_new(ff_c).astype(jnp.bfloat16)
        part = jnp.dot(ff_c, wffo_ref[c0:c1, :], preferred_element_type=jnp.float32)
        acc = part if acc is None else acc + part
    ff_out = acc + bffo_ref[...]
    h2 = _layernorm_f32(ff_out + h1, ln2_g_ref[...], ln2_b_ref[...], eps)
    h2_bf = h2.astype(jnp.bfloat16)

    h_scr[...] = h2_bf                                    # carried state (VMEM only)

    @pl.when(layer == pl.num_programs(1) - 1)
    def _():
        o_ref[0] = h2_bf[:1, :]                           # first token only -> HBM once


def albert_encoder_first_token(h0, attn_bias, lp, cfg):
    """Runs the shared ALBERT layer num_layers times; returns only the first token [B,1,H]."""
    B, S, H = h0.shape
    I = lp["w_ffn"].shape[1]
    nh = cfg["num_heads"]
    dh = H // nh
    num_layers = cfg["num_layers"]
    ffn_chunk = I if I <= 512 or I % 512 != 0 else 512

    batch3 = lambda b, l: (b, 0, 0)
    const2 = lambda b, l: (0, 0)

    return pl.pallas_call(
        functools.partial(_albert_layer_kernel, num_heads=nh, head_dim=dh,
                          eps=LN_EPS, ffn_chunk=ffn_chunk),
        grid_spec=pltpu.PrefetchScalarGridSpec(
            num_scalar_prefetch=0,
            grid=(B, num_layers),                     # layers last => weights + state resident
            in_specs=[
                pl.BlockSpec((1, S, H), batch3),      # hidden-state input (layer 0 only)
                pl.BlockSpec((1, 1, S), batch3),      # additive attention mask bias (f32)
                pl.BlockSpec((H, 3 * H), const2),     # fused Wq|Wk|Wv   (VMEM-resident)
                pl.BlockSpec((1, 3 * H), const2),
                pl.BlockSpec((H, H), const2),         # Wo
                pl.BlockSpec((1, H), const2),
                pl.BlockSpec((1, H), const2),         # attn LN gamma
                pl.BlockSpec((1, H), const2),         # attn LN beta
                pl.BlockSpec((H, I), const2),         # W_ffn
                pl.BlockSpec((1, I), const2),
                pl.BlockSpec((I, H), const2),         # W_ffn_out
                pl.BlockSpec((1, H), const2),
                pl.BlockSpec((1, H), const2),         # ffn LN gamma
                pl.BlockSpec((1, H), const2),         # ffn LN beta
            ],
            out_specs=pl.BlockSpec((1, 1, H), batch3),           # first token only
            scratch_shapes=[pltpu.VMEM((S, H), jnp.bfloat16),    # carried hidden state
                            pltpu.VMEM((S, H), jnp.bfloat16)],   # per-head context buffer
        ),
        out_shape=jax.ShapeDtypeStruct((B, 1, H), jnp.bfloat16),
        compiler_params=pltpu.CompilerParams(
            dimension_semantics=("parallel", "arbitrary"),
            vmem_limit_bytes=ENC_VMEM_LIMIT),
        # TODO(synk): on v7x at real ALBERT sizes, single-buffer the constant weight specs
        # (pipeline_mode=pl.Buffered(1)) to halve resident-weight VMEM under the 64 MiB cap.
    )(h0, attn_bias,
      lp["wqkv"], lp["bqkv"], lp["wo"], lp["bo"], lp["ln1_g"], lp["ln1_b"],
      lp["w_ffn"], lp["b_ffn"], lp["w_ffn_out"], lp["b_ffn_out"],
      lp["ln2_g"], lp["ln2_b"])


# ----------------------------------------------------------------------------
# Fused pooler (first-token dense + tanh) + classifier MLP, lane-padded logits
# ----------------------------------------------------------------------------
def _pooler_classifier_kernel(x_ref, pw_ref, pb_ref, w1_ref, b1_ref, w2_ref, b2_ref, o_ref):
    x = x_ref[...]                                                     # [tb, H] bf16
    pooled = jnp.tanh(jnp.dot(x, pw_ref[...], preferred_element_type=jnp.float32)
                      + pb_ref[...])
    h = jnp.dot(pooled.astype(jnp.bfloat16), w1_ref[...],
                preferred_element_type=jnp.float32) + b1_ref[...]
    h = jnp.maximum(h, 0.0)            # ReLU; Dropout(0.2) is identity at inference
    logits = jnp.dot(h.astype(jnp.bfloat16), w2_ref[...],
                     preferred_element_type=jnp.float32) + b2_ref[...]
    o_ref[...] = logits.astype(o_ref.dtype)                            # lane-dense [tb, 128]


def pooler_classifier(first_tok, pw, pb, w1, b1, w2p, b2p):
    B, H = first_tok.shape
    Hc = w1.shape[1]
    Lp = w2p.shape[1]
    tb = min(B, 256)
    x_p = _pad_rows(first_tok, tb)
    Bp = x_p.shape[0]
    out = pl.pallas_call(
        _pooler_classifier_kernel,
        grid=(Bp // tb,),
        in_specs=[pl.BlockSpec((tb, H), lambda i: (i, 0)),
                  pl.BlockSpec((H, H), lambda i: (0, 0)),
                  pl.BlockSpec((1, H), lambda i: (0, 0)),
                  pl.BlockSpec((H, Hc), lambda i: (0, 0)),
                  pl.BlockSpec((1, Hc), lambda i: (0, 0)),
                  pl.BlockSpec((Hc, Lp), lambda i: (0, 0)),
                  pl.BlockSpec((1, Lp), lambda i: (0, 0))],
        out_specs=pl.BlockSpec((tb, Lp), lambda i: (i, 0)),
        out_shape=jax.ShapeDtypeStruct((Bp, Lp), jnp.float32),
        compiler_params=pltpu.CompilerParams(dimension_semantics=("parallel",)),
    )(x_p, pw, pb, w1, b1, w2p, b2p)
    return out[:B] if Bp != B else out


# ----------------------------------------------------------------------------
# Parameter init (f32, like the PyTorch module) + bf16/fused packing for the kernels
# ----------------------------------------------------------------------------
def init_params(key, cfg):
    ks = iter(jax.random.split(key, 32))

    def w(shape, scale=0.02):
        return scale * jax.random.normal(next(ks), shape, dtype=jnp.float32)

    H, E, I = cfg["hidden_size"], cfg["embedding_size"], cfg["intermediate_size"]
    return {
        "word_emb": w((cfg["vocab_size"], E)),
        "pos_emb": w((cfg["max_position_embeddings"], E)),
        "tok_type_emb": w((cfg["type_vocab_size"], E)),
        "emb_ln_g": jnp.ones((E,), jnp.float32),
        "emb_ln_b": jnp.zeros((E,), jnp.float32),
        "emb_proj_w": w((E, H)),
        "emb_proj_b": jnp.zeros((H,), jnp.float32),
        "layer": {   # single shared transformer layer (ALBERT parameter sharing)
            "wq": w((H, H)), "bq": jnp.zeros((H,), jnp.float32),
            "wk": w((H, H)), "bk": jnp.zeros((H,), jnp.float32),
            "wv": w((H, H)), "bv": jnp.zeros((H,), jnp.float32),
            "wo": w((H, H)), "bo": jnp.zeros((H,), jnp.float32),
            "attn_ln_g": jnp.ones((H,), jnp.float32),
            "attn_ln_b": jnp.zeros((H,), jnp.float32),
            "w_ffn": w((H, I)), "b_ffn": jnp.zeros((I,), jnp.float32),
            "w_ffn_out": w((I, H)), "b_ffn_out": jnp.zeros((H,), jnp.float32),
            "ffn_ln_g": jnp.ones((H,), jnp.float32),
            "ffn_ln_b": jnp.zeros((H,), jnp.float32),
        },
        "pooler_w": w((H, H)),
        "pooler_b": jnp.zeros((H,), jnp.float32),
        "cls_w1": w((H, 256)), "cls_b1": jnp.zeros((256,), jnp.float32),
        "cls_w2": w((256, cfg["num_labels"])),
        "cls_b2": jnp.zeros((cfg["num_labels"],), jnp.float32),
    }


def prepare_params(p, cfg):
    """Cast weights to bf16, fuse Q|K|V (with 1/sqrt(head_dim) folded into the Q columns),
    reshape biases/LN params to [1,N] f32, pad classifier logits weights to 128 lanes."""
    bf = lambda a: a.astype(jnp.bfloat16)
    row = lambda a: a.reshape(1, -1).astype(jnp.float32)
    lp = p["layer"]
    H = cfg["hidden_size"]
    dh = H // cfg["num_heads"]
    scale = 1.0 / math.sqrt(dh)
    L = cfg["num_labels"]
    Lp = max(LANE, L)
    w2p = jnp.zeros((p["cls_w2"].shape[0], Lp), jnp.float32).at[:, :L].set(p["cls_w2"])
    b2p = jnp.zeros((Lp,), jnp.float32).at[:L].set(p["cls_b2"])
    return {
        "word_emb": p["word_emb"], "pos_emb": p["pos_emb"], "tok_type_emb": p["tok_type_emb"],
        "emb_ln_g": row(p["emb_ln_g"]), "emb_ln_b": row(p["emb_ln_b"]),
        "emb_proj_w": bf(p["emb_proj_w"]), "emb_proj_b": row(p["emb_proj_b"]),
        "layer": {
            "wqkv": bf(jnp.concatenate([lp["wq"] * scale, lp["wk"], lp["wv"]], axis=1)),
            "bqkv": row(jnp.concatenate([lp["bq"] * scale, lp["bk"], lp["bv"]])),
            "wo": bf(lp["wo"]), "bo": row(lp["bo"]),
            "ln1_g": row(lp["attn_ln_g"]), "ln1_b": row(lp["attn_ln_b"]),
            "w_ffn": bf(lp["w_ffn"]), "b_ffn": row(lp["b_ffn"]),
            "w_ffn_out": bf(lp["w_ffn_out"]), "b_ffn_out": row(lp["b_ffn_out"]),
            "ln2_g": row(lp["ffn_ln_g"]), "ln2_b": row(lp["ffn_ln_b"]),
        },
        "pooler_w": bf(p["pooler_w"]), "pooler_b": row(p["pooler_b"]),
        "cls_w1": bf(p["cls_w1"]), "cls_b1": row(p["cls_b1"]),
        "cls_w2p": bf(w2p), "cls_b2p": row(b2p),
    }


# ----------------------------------------------------------------------------
# Forward pass (glue in plain JAX; all hot paths in the Pallas kernels above)
# ----------------------------------------------------------------------------
def classification_albert_forward(pp, input_ids, attention_mask, cfg):
    B, S = input_ids.shape
    H = cfg["hidden_size"]

    # ---- embeddings (kept in f32 through the LayerNorm; this path is mem-bound) ----
    # TODO(synk): the embedding row-gather stays in XLA (no clean tiled Pallas equivalent here).
    word = jnp.take(pp["word_emb"], input_ids, axis=0)                 # [B,S,E]
    pos = pp["pos_emb"][:S][None, :, :]
    tok = pp["tok_type_emb"][0][None, None, :]                         # token_type_ids == 0
    emb = (word + pos + tok).reshape(B * S, -1)                        # f32
    emb = layernorm(emb, pp["emb_ln_g"], pp["emb_ln_b"])               # [B*S, E] bf16
    h = dense(emb, pp["emb_proj_w"], pp["emb_proj_b"])                 # [B*S, H] bf16
    h = h.reshape(B, S, H)                                             # free reshape

    # ---- additive attention bias from the mask (kept in f32) ----
    attn_bias = ((1.0 - attention_mask.astype(jnp.float32)) * -1e9).reshape(B, 1, S)

    # ---- shared ALBERT layer repeated num_layers times; only token 0 is emitted ----
    first_tok = albert_encoder_first_token(h, attn_bias, pp["layer"], cfg)  # [B,1,H] bf16
    first_tok = first_tok[:, 0, :]                                          # [B,H] bf16

    # ---- pooler + classifier (fused, lane-padded logits) ----
    logits_padded = pooler_classifier(first_tok, pp["pooler_w"], pp["pooler_b"],
                                      pp["cls_w1"], pp["cls_b1"],
                                      pp["cls_w2p"], pp["cls_b2p"])
    return logits_padded[:, :cfg["num_labels"]]


# ----------------------------------------------------------------------------
# Main
# ----------------------------------------------------------------------------
if __name__ == "__main__":
    cfg = dict(
        vocab_size=100,
        embedding_size=16,
        hidden_size=32,
        num_heads=4,
        intermediate_size=64,
        num_layers=2,
        max_position_embeddings=16,
        type_vocab_size=2,
        num_labels=2,
    )

    key = jax.random.PRNGKey(0)
    k_params, k_ids = jax.random.split(key)
    params = prepare_params(init_params(k_params, cfg), cfg)

    B, S = 2, 8
    input_ids = jax.random.randint(k_ids, (B, S), 0, cfg["vocab_size"], dtype=jnp.int32)
    attention_mask = jnp.array(
        [[1, 1, 1, 1, 1, 1, 1, 1],
         [1, 1, 1, 1, 1, 1, 0, 0]], dtype=jnp.int32)

    forward = jax.jit(functools.partial(classification_albert_forward, cfg=cfg))
    logits = forward(params, input_ids, attention_mask)
    logits = jax.block_until_ready(logits)

    assert logits.shape == (B, cfg["num_labels"])
    assert bool(jnp.all(jnp.isfinite(logits)))
    print("KERNEL_OK")
</pallas_src>

<mosaic_0001>
module attributes {stable_mosaic.version = 11 : i64} {
  func.func @_matmul_kernel(%arg0: i32, %arg1: i32, %arg2: i32, %arg3: memref<16x16xbf16, #tpu.memory_space<vmem>>, %arg4: memref<16x32xbf16, #tpu.memory_space<vmem>>, %arg5: memref<1x32xf32, #tpu.memory_space<vmem>>, %arg6: memref<16x32xbf16, #tpu.memory_space<vmem>>, %arg7: memref<16x32xf32, #tpu.memory_space<vmem>>) attributes {dimension_semantics = [#tpu.dimension_semantics<parallel>, #tpu.dimension_semantics<parallel>, #tpu.dimension_semantics<arbitrary>], iteration_bounds = array<i64: 1, 1, 1>, scalar_prefetch = 0 : i64, scratch_operands = 1 : i64, tpu.core_type = #tpu.core_type<tc>, window_params = [{transform_indices = @transform_0, window_bounds = array<i64: 16, 16>}, {transform_indices = @transform_1, window_bounds = array<i64: 16, 32>}, {transform_indices = @transform_2, window_bounds = array<i64: 1, 32>}, {transform_indices = @transform_3, window_bounds = array<i64: 16, 32>}]} {
    %c0_i32 = arith.constant 0 : i32
    %0 = arith.cmpi eq, %arg2, %c0_i32 : i32
    %1 = arith.extui %0 : i1 to i32
    %c0_i32_0 = arith.constant 0 : i32
    %2 = arith.cmpi ne, %1, %c0_i32_0 : i32
    scf.if %2 {
      %cst_10 = arith.constant 0.000000e+00 : f32
      %12 = vector.broadcast %cst_10 : f32 to vector<16x32xf32>
      %c0_11 = arith.constant 0 : index
      %c0_12 = arith.constant 0 : index
      %13 = vector.load %arg7[%c0_11, %c0_12] : memref<16x32xf32, #tpu.memory_space<vmem>>, vector<16x32xf32>
      tpu.vector_store %arg7[%c0_11, %c0_12], %12 {strides = array<i32>} : memref<16x32xf32, #tpu.memory_space<vmem>>, vector<16x32xf32>,
    } else {
    }
    %c0 = arith.constant 0 : index
    %c0_1 = arith.constant 0 : index
    %3 = vector.load %arg7[%c0, %c0_1] : memref<16x32xf32, #tpu.memory_space<vmem>>, vector<16x32xf32>
    %c0_2 = arith.constant 0 : index
    %c0_3 = arith.constant 0 : index
    %4 = vector.load %arg3[%c0_2, %c0_3] : memref<16x16xbf16, #tpu.memory_space<vmem>>, vector<16x16xbf16>
    %c0_4 = arith.constant 0 : index
    %c0_5 = arith.constant 0 : index
    %5 = vector.load %arg4[%c0_4, %c0_5] : memref<16x32xbf16, #tpu.memory_space<vmem>>, vector<16x32xbf16>
    %cst = arith.constant dense<0.000000e+00> : vector<16x32xf32>
    %6 = tpu.matmul %4, %5, %cst {dimension_numbers = #tpu.dot_dimension_numbers<[1], [0], [0], [1], [0, 0, 1, 1], [], []>} : vector<16x16xbf16>, vector<16x32xbf16>, vector<16x32xf32> -> vector<16x32xf32>
    %7 = arith.addf %3, %6 : vector<16x32xf32>
    %c0_6 = arith.constant 0 : index
    %c0_7 = arith.constant 0 : index
    %8 = vector.load %arg7[%c0_6, %c0_7] : memref<16x32xf32, #tpu.memory_space<vmem>>, vector<16x32xf32>
    tpu.vector_store %arg7[%c0_6, %c0_7], %7 {strides = array<i32>} : memref<16x32xf32, #tpu.memory_space<vmem>>, vector<16x32xf32>,
    %c0_i32_8 = arith.constant 0 : i32
    %9 = arith.cmpi eq, %arg2, %c0_i32_8 : i32
    %10 = arith.extui %9 : i1 to i32
    %c0_i32_9 = arith.constant 0 : i32
    %11 = arith.cmpi ne, %10, %c0_i32_9 : i32
    scf.if %11 {
      %c0_10 = arith.constant 0 : index
      %c0_11 = arith.constant 0 : index
      %12 = vector.load %arg7[%c0_10, %c0_11] : memref<16x32xf32, #tpu.memory_space<vmem>>, vector<16x32xf32>
      %c0_12 = arith.constant 0 : index
      %c0_13 = arith.constant 0 : index
      %13 = vector.load %arg5[%c0_12, %c0_13] : memref<1x32xf32, #tpu.memory_space<vmem>>, vector<1x32xf32>
      %14 = vector.broadcast %13 : vector<1x32xf32> to vector<16x32xf32>
      %15 = arith.addf %12, %14 : vector<16x32xf32>
      %16 = arith.truncf %15 : vector<16x32xf32> to vector<16x32xbf16>
      %c0_14 = arith.constant 0 : index
      %c0_15 = arith.constant 0 : index
      %17 = vector.load %arg6[%c0_14, %c0_15] : memref<16x32xbf16, #tpu.memory_space<vmem>>, vector<16x32xbf16>
      tpu.vector_store %arg6[%c0_14, %c0_15], %16 {strides = array<i32>} : memref<16x32xbf16, #tpu.memory_space<vmem>>, vector<16x32xbf16>,
    } else {
    }
    return
  }
  func.func @transform_0(%arg0: i32, %arg1: i32, %arg2: i32) -> (i32, i32) {
    %c0_i32 = arith.constant 0 : i32
    return %arg0, %arg2 : i32, i32
  }
  func.func @transform_1(%arg0: i32, %arg1: i32, %arg2: i32) -> (i32, i32) {
    %c0_i32 = arith.constant 0 : i32
    return %arg2, %arg1 : i32, i32
  }
  func.func @transform_2(%arg0: i32, %arg1: i32, %arg2: i32) -> (i32, i32) {
    %c0_i32 = arith.constant 0 : i32
    %c0_i32_0 = arith.constant 0 : i32
    return %c0_i32, %arg1 : i32, i32
  }
  func.func @transform_3(%arg0: i32, %arg1: i32, %arg2: i32) -> (i32, i32) {
    %c0_i32 = arith.constant 0 : i32
    return %arg0, %arg1 : i32, i32
  }
}

module attributes {stable_mosaic.version = 11 : i64} {
  func.func @_ln_kernel(%arg0: i32, %arg1: memref<16x16xf32, #tpu.memory_space<vmem>>, %arg2: memref<1x16xf32, #tpu.memory_space<vmem>>, %arg3: memref<1x16xf32, #tpu.memory_space<vmem>>, %arg4: memref<16x16xbf16, #tpu.memory_space<vmem>>) attributes {dimension_semantics = [#tpu.dimension_semantics<parallel>], iteration_bounds = array<i64: 1>, scalar_prefetch = 0 : i64, scratch_operands = 0 : i64, tpu.core_type = #tpu.core_type<tc>, window_params = [{transform_indices = @transform_0, window_bounds = array<i64: 16, 16>}, {pipeline_mode = #tpu.pipeline_mode<synchronous>, transform_indices = @transform_1, window_bounds = array<i64: 1, 16>}, {pipeline_mode = #tpu.pipeline_mode<synchronous>, transform_indices = @transform_2, window_bounds = array<i64: 1, 16>}, {transform_indices = @transform_3, window_bounds = array<i64: 16, 16>}]} {
    %c0 = arith.constant 0 : index
    %c0_0 = arith.constant 0 : index
    %0 = vector.load %arg1[%c0, %c0_0] : memref<16x16xf32, #tpu.memory_space<vmem>>, vector<16x16xf32>
    %c0_1 = arith.constant 0 : index
    %c0_2 = arith.constant 0 : index
    %1 = vector.load %arg2[%c0_1, %c0_2] : memref<1x16xf32, #tpu.memory_space<vmem>>, vector<1x16xf32>
    %c0_3 = arith.constant 0 : index
    %c0_4 = arith.constant 0 : index
    %2 = vector.load %arg3[%c0_3, %c0_4] : memref<1x16xf32, #tpu.memory_space<vmem>>, vector<1x16xf32>
    %cst = arith.constant dense<0.000000e+00> : vector<16xf32>
    %3 = vector.multi_reduction <add>, %0, %cst [1] : vector<16x16xf32> to vector<16xf32>
    %4 = vector.shape_cast %3 : vector<16xf32> to vector<16x1xf32>
    %cst_5 = arith.constant 1.600000e+01 : f32
    %5 = vector.broadcast %cst_5 : f32 to vector<16x1xf32>
    %6 = arith.divf %4, %5 : vector<16x1xf32>
    %7 = vector.broadcast %6 : vector<16x1xf32> to vector<16x16xf32>
    %8 = arith.subf %0, %7 : vector<16x16xf32>
    %9 = arith.mulf %8, %8 : vector<16x16xf32>
    %cst_6 = arith.constant dense<0.000000e+00> : vector<16xf32>
    %10 = vector.multi_reduction <add>, %9, %cst_6 [1] : vector<16x16xf32> to vector<16xf32>
    %11 = vector.shape_cast %10 : vector<16xf32> to vector<16x1xf32>
    %cst_7 = arith.constant 1.600000e+01 : f32
    %12 = vector.broadcast %cst_7 : f32 to vector<16x1xf32>
    %13 = arith.divf %11, %12 : vector<16x1xf32>
    %14 = vector.broadcast %6 : vector<16x1xf32> to vector<16x16xf32>
    %15 = arith.subf %0, %14 : vector<16x16xf32>
    %cst_8 = arith.constant 9.99999996E-13 : f32
    %16 = vector.broadcast %cst_8 : f32 to vector<16x1xf32>
    %17 = arith.addf %13, %16 : vector<16x1xf32>
    %18 = math.rsqrt %17 : vector<16x1xf32>
    %19 = vector.broadcast %18 : vector<16x1xf32> to vector<16x16xf32>
    %20 = arith.mulf %15, %19 : vector<16x16xf32>
    %21 = vector.broadcast %1 : vector<1x16xf32> to vector<16x16xf32>
    %22 = arith.mulf %20, %21 : vector<16x16xf32>
    %23 = vector.broadcast %2 : vector<1x16xf32> to vector<16x16xf32>
    %24 = arith.addf %22, %23 : vector<16x16xf32>
    %25 = arith.truncf %24 : vector<16x16xf32> to vector<16x16xbf16>
    %c0_9 = arith.constant 0 : index
    %c0_10 = arith.constant 0 : index
    %26 = vector.load %arg4[%c0_9, %c0_10] : memref<16x16xbf16, #tpu.memory_space<vmem>>, vector<16x16xbf16>
    tpu.vector_store %arg4[%c0_9, %c0_10], %25 {strides = array<i32>} : memref<16x16xbf16, #tpu.memory_space<vmem>>, vector<16x16xbf16>,
    return
  }
  func.func @transform_0(%arg0: i32) -> (i32, i32) {
    %c0_i32 = arith.constant 0 : i32
    %c0_i32_0 = arith.constant 0 : i32
    return %arg0, %c0_i32 : i32, i32
  }
  func.func @transform_1(%arg0: i32) -> (i32, i32) {
    %c0_i32 = arith.constant 0 : i32
    %c0_i32_0 = arith.constant 0 : i32
    %c0_i32_1 = arith.constant 0 : i32
    return %c0_i32, %c0_i32_0 : i32, i32
  }
  func.func @transform_2(%arg0: i32) -> (i32, i32) {
    %c0_i32 = arith.constant 0 : i32
    %c0_i32_0 = arith.constant 0 : i32
    %c0_i32_1 = arith.constant 0 : i32
    return %c0_i32, %c0_i32_0 : i32, i32
  }
  func.func @transform_3(%arg0: i32) -> (i32, i32) {
    %c0_i32 = arith.constant 0 : i32
    %c0_i32_0 = arith.constant 0 : i32
    return %arg0, %c0_i32 : i32, i32
  }
}

module attributes {stable_mosaic.version = 11 : i64} {
  func.func @_pooler_classifier_kernel(%arg0: i32, %arg1: memref<2x32xbf16, #tpu.memory_space<vmem>>, %arg2: memref<32x32xbf16, #tpu.memory_space<vmem>>, %arg3: memref<1x32xf32, #tpu.memory_space<vmem>>, %arg4: memref<32x256xbf16, #tpu.memory_space<vmem>>, %arg5: memref<1x256xf32, #tpu.memory_space<vmem>>, %arg6: memref<256x128xbf16, #tpu.memory_space<vmem>>, %arg7: memref<1x128xf32, #tpu.memory_space<vmem>>, %arg8: memref<2x128xf32, #tpu.memory_space<vmem>>) attributes {dimension_semantics = [#tpu.dimension_semantics<parallel>], iteration_bounds = array<i64: 1>, scalar_prefetch = 0 : i64, scratch_operands = 0 : i64, tpu.core_type = #tpu.core_type<tc>, window_params = [{transform_indices = @transform_0, window_bounds = array<i64: 2, 32>}, {pipeline_mode = #tpu.pipeline_mode<synchronous>, transform_indices = @transform_1, window_bounds = array<i64: 32, 32>}, {pipeline_mode = #tpu.pipeline_mode<synchronous>, transform_indices = @transform_2, window_bounds = array<i64: 1, 32>}, {pipeline_mode = #tpu.pipeline_mode<synchronous>, transform_indices = @transform_3, window_bounds = array<i64: 32, 256>}, {pipeline_mode = #tpu.pipeline_mode<synchronous>, transform_indices = @transform_4, window_bounds = array<i64: 1, 256>}, {pipeline_mode = #tpu.pipeline_mode<synchronous>, transform_indices = @transform_5, window_bounds = array<i64: 256, 128>}, {pipeline_mode = #tpu.pipeline_mode<synchronous>, transform_indices = @transform_6, window_bounds = array<i64: 1, 128>}, {transform_indices = @transform_7, window_bounds = array<i64: 2, 128>}]} {
    %c0 = arith.constant 0 : index
    %c0_0 = arith.constant 0 : index
    %0 = vector.load %arg1[%c0, %c0_0] : memref<2x32xbf16, #tpu.memory_space<vmem>>, vector<2x32xbf16>
    %c0_1 = arith.constant 0 : index
    %c0_2 = arith.constant 0 : index
    %1 = vector.load %arg2[%c0_1, %c0_2] : memref<32x32xbf16, #tpu.memory_space<vmem>>, vector<32x32xbf16>
    %cst = arith.constant dense<0.000000e+00> : vector<2x32xf32>
    %2 = tpu.matmul %0, %1, %cst {dimension_numbers = #tpu.dot_dimension_numbers<[1], [0], [0], [1], [0, 0, 1, 1], [], []>} : vector<2x32xbf16>, vector<32x32xbf16>, vector<2x32xf32> -> vector<2x32xf32>
    %c0_3 = arith.constant 0 : index
    %c0_4 = arith.constant 0 : index
    %3 = vector.load %arg3[%c0_3, %c0_4] : memref<1x32xf32, #tpu.memory_space<vmem>>, vector<1x32xf32>
    %4 = vector.broadcast %3 : vector<1x32xf32> to vector<2x32xf32>
    %5 = arith.addf %2, %4 : vector<2x32xf32>
    %6 = math.tanh %5 : vector<2x32xf32>
    %7 = arith.truncf %6 : vector<2x32xf32> to vector<2x32xbf16>
    %c0_5 = arith.constant 0 : index
    %c0_6 = arith.constant 0 : index
    %8 = vector.load %arg4[%c0_5, %c0_6] : memref<32x256xbf16, #tpu.memory_space<vmem>>, vector<32x256xbf16>
    %cst_7 = arith.constant dense<0.000000e+00> : vector<2x256xf32>
    %9 = tpu.matmul %7, %8, %cst_7 {dimension_numbers = #tpu.dot_dimension_numbers<[1], [0], [0], [1], [0, 0, 1, 1], [], []>} : vector<2x32xbf16>, vector<32x256xbf16>, vector<2x256xf32> -> vector<2x256xf32>
    %c0_8 = arith.constant 0 : index
    %c0_9 = arith.constant 0 : index
    %10 = vector.load %arg5[%c0_8, %c0_9] : memref<1x256xf32, #tpu.memory_space<vmem>>, vector<1x256xf32>
    %11 = vector.broadcast %10 : vector<1x256xf32> to vector<2x256xf32>
    %12 = arith.addf %9, %11 : vector<2x256xf32>
    %cst_10 = arith.constant 0.000000e+00 : f32
    %13 = vector.broadcast %cst_10 : f32 to vector<2x256xf32>
    %14 = arith.maximumf %12, %13 : vector<2x256xf32>
    %15 = arith.truncf %14 : vector<2x256xf32> to vector<2x256xbf16>
    %c0_11 = arith.constant 0 : index
    %c0_12 = arith.constant 0 : index
    %16 = vector.load %arg6[%c0_11, %c0_12] : memref<256x128xbf16, #tpu.memory_space<vmem>>, vector<256x128xbf16>
    %cst_13 = arith.constant dense<0.000000e+00> : vector<2x128xf32>
    %17 = tpu.matmul %15, %16, %cst_13 {dimension_numbers = #tpu.dot_dimension_numbers<[1], [0], [0], [1], [0, 0, 1, 1], [], []>} : vector<2x256xbf16>, vector<256x128xbf16>, vector<2x128xf32> -> vector<2x128xf32>
    %c0_14 = arith.constant 0 : index
    %c0_15 = arith.constant 0 : index
    %18 = vector.load %arg7[%c0_14, %c0_15] : memref<1x128xf32, #tpu.memory_space<vmem>>, vector<1x128xf32>
    %19 = vector.broadcast %18 : vector<1x128xf32> to vector<2x128xf32>
    %20 = arith.addf %17, %19 : vector<2x128xf32>
    %c0_16 = arith.constant 0 : index
    %c0_17 = arith.constant 0 : index
    %21 = vector.load %arg8[%c0_16, %c0_17] : memref<2x128xf32, #tpu.memory_space<vmem>>, vector<2x128xf32>
    tpu.vector_store %arg8[%c0_16, %c0_17], %20 {strides = array<i32>} : memref<2x128xf32, #tpu.memory_space<vmem>>, vector<2x128xf32>,
    return
  }
  func.func @transform_0(%arg0: i32) -> (i32, i32) {
    %c0_i32 = arith.constant 0 : i32
    %c0_i32_0 = arith.constant 0 : i32
    return %arg0, %c0_i32 : i32, i32
  }
  func.func @transform_1(%arg0: i32) -> (i32, i32) {
    %c0_i32 = arith.constant 0 : i32
    %c0_i32_0 = arith.constant 0 : i32
    %c0_i32_1 = arith.constant 0 : i32
    return %c0_i32, %c0_i32_0 : i32, i32
  }
  func.func @transform_2(%arg0: i32) -> (i32, i32) {
    %c0_i32 = arith.constant 0 : i32
    %c0_i32_0 = arith.constant 0 : i32
    %c0_i32_1 = arith.constant 0 : i32
    return %c0_i32, %c0_i32_0 : i32, i32
  }
  func.func @transform_3(%arg0: i32) -> (i32, i32) {
    %c0_i32 = arith.constant 0 : i32
    %c0_i32_0 = arith.constant 0 : i32
    %c0_i32_1 = arith.constant 0 : i32
    return %c0_i32, %c0_i32_0 : i32, i32
  }
  func.func @transform_4(%arg0: i32) -> (i32, i32) {
    %c0_i32 = arith.constant 0 : i32
    %c0_i32_0 = arith.constant 0 : i32
    %c0_i32_1 = arith.constant 0 : i32
    return %c0_i32, %c0_i32_0 : i32, i32
  }
  func.func @transform_5(%arg0: i32) -> (i32, i32) {
    %c0_i32 = arith.constant 0 : i32
    %c0_i32_0 = arith.constant 0 : i32
    %c0_i32_1 = arith.constant 0 : i32
    return %c0_i32, %c0_i32_0 : i32, i32
  }
  func.func @transform_6(%arg0: i32) -> (i32, i32) {
    %c0_i32 = arith.constant 0 : i32
    %c0_i32_0 = arith.constant 0 : i32
    %c0_i32_1 = arith.constant 0 : i32
    return %c0_i32, %c0_i32_0 : i32, i32
  }
  func.func @transform_7(%arg0: i32) -> (i32, i32) {
    %c0_i32 = arith.constant 0 : i32
    %c0_i32_0 = arith.constant 0 : i32
    return %arg0, %c0_i32 : i32, i32
  }
}

module attributes {stable_mosaic.version = 11 : i64} {
  func.func @_albert_layer_kernel(%arg0: i32, %arg1: i32, %arg2: memref<1x8x32xbf16, #tpu.memory_space<vmem>>, %arg3: memref<1x1x8xf32, #tpu.memory_space<vmem>>, %arg4: memref<32x96xbf16, #tpu.memory_space<vmem>>, %arg5: memref<1x96xf32, #tpu.memory_space<vmem>>, %arg6: memref<32x32xbf16, #tpu.memory_space<vmem>>, %arg7: memref<1x32xf32, #tpu.memory_space<vmem>>, %arg8: memref<1x32xf32, #tpu.memory_space<vmem>>, %arg9: memref<1x32xf32, #tpu.memory_space<vmem>>, %arg10: memref<32x64xbf16, #tpu.memory_space<vmem>>, %arg11: memref<1x64xf32, #tpu.memory_space<vmem>>, %arg12: memref<64x32xbf16, #tpu.memory_space<vmem>>, %arg13: memref<1x32xf32, #tpu.memory_space<vmem>>, %arg14: memref<1x32xf32, #tpu.memory_space<vmem>>, %arg15: memref<1x32xf32, #tpu.memory_space<vmem>>, %arg16: memref<1x1x32xbf16, #tpu.memory_space<vmem>>, %arg17: memref<8x32xbf16, #tpu.memory_space<vmem>>, %arg18: memref<8x32xbf16, #tpu.memory_space<vmem>>) attributes {dimension_semantics = [#tpu.dimension_semantics<parallel>, #tpu.dimension_semantics<arbitrary>], iteration_bounds = array<i64: 2, 2>, scalar_prefetch = 0 : i64, scratch_operands = 2 : i64, tpu.core_type = #tpu.core_type<tc>, window_params = [{transform_indices = @transform_0, window_bounds = array<i64: 1, 8, 32>}, {transform_indices = @transform_1, window_bounds = array<i64: 1, 1, 8>}, {pipeline_mode = #tpu.pipeline_mode<synchronous>, transform_indices = @transform_2, window_bounds = array<i64: 32, 96>}, {pipeline_mode = #tpu.pipeline_mode<synchronous>, transform_indices = @transform_3, window_bounds = array<i64: 1, 96>}, {pipeline_mode = #tpu.pipeline_mode<synchronous>, transform_indices = @transform_4, window_bounds = array<i64: 32, 32>}, {pipeline_mode = #tpu.pipeline_mode<synchronous>, transform_indices = @transform_5, window_bounds = array<i64: 1, 32>}, {pipeline_mode = #tpu.pipeline_mode<synchronous>, transform_indices = @transform_6, window_bounds = array<i64: 1, 32>}, {pipeline_mode = #tpu.pipeline_mode<synchronous>, transform_indices = @transform_7, window_bounds = array<i64: 1, 32>}, {pipeline_mode = #tpu.pipeline_mode<synchronous>, transform_indices = @transform_8, window_bounds = array<i64: 32, 64>}, {pipeline_mode = #tpu.pipeline_mode<synchronous>, transform_indices = @transform_9, window_bounds = array<i64: 1, 64>}, {pipeline_mode = #tpu.pipeline_mode<synchronous>, transform_indices = @transform_10, window_bounds = array<i64: 64, 32>}, {pipeline_mode = #tpu.pipeline_mode<synchronous>, transform_indices = @transform_11, window_bounds = array<i64: 1, 32>}, {pipeline_mode = #tpu.pipeline_mode<synchronous>, transform_indices = @transform_12, window_bounds = array<i64: 1, 32>}, {pipeline_mode = #tpu.pipeline_mode<synchronous>, transform_indices = @transform_13, window_bounds = array<i64: 1, 32>}, {transform_indices = @transform_14, window_bounds = array<i64: 1, 1, 32>}]} {
    %c0_i32 = arith.constant 0 : i32
    %0 = arith.cmpi eq, %arg1, %c0_i32 : i32
    %1 = arith.extui %0 : i1 to i32
    %c0_i32_0 = arith.constant 0 : i32
    %2 = arith.cmpi ne, %1, %c0_i32_0 : i32
    scf.if %2 {
      %c0_72 = arith.constant 0 : index
      %c0_73 = arith.constant 0 : index
      %c0_74 = arith.constant 0 : index
      %181 = vector.load %arg2[%c0_72, %c0_73, %c0_74] : memref<1x8x32xbf16, #tpu.memory_space<vmem>>, vector<1x8x32xbf16>
      %182 = vector.shape_cast %181 : vector<1x8x32xbf16> to vector<8x32xbf16>
      %c0_75 = arith.constant 0 : index
      %c0_76 = arith.constant 0 : index
      %183 = vector.load %arg17[%c0_75, %c0_76] : memref<8x32xbf16, #tpu.memory_space<vmem>>, vector<8x32xbf16>
      tpu.vector_store %arg17[%c0_75, %c0_76], %182 {strides = array<i32>} : memref<8x32xbf16, #tpu.memory_space<vmem>>, vector<8x32xbf16>,
    } else {
    }
    %c0 = arith.constant 0 : index
    %c0_1 = arith.constant 0 : index
    %3 = vector.load %arg17[%c0, %c0_1] : memref<8x32xbf16, #tpu.memory_space<vmem>>, vector<8x32xbf16>
    %c0_2 = arith.constant 0 : index
    %c0_3 = arith.constant 0 : index
    %4 = vector.load %arg4[%c0_2, %c0_3] : memref<32x96xbf16, #tpu.memory_space<vmem>>, vector<32x96xbf16>
    %cst = arith.constant dense<0.000000e+00> : vector<8x96xf32>
    %5 = tpu.matmul %3, %4, %cst {dimension_numbers = #tpu.dot_dimension_numbers<[1], [0], [0], [1], [0, 0, 1, 1], [], []>} : vector<8x32xbf16>, vector<32x96xbf16>, vector<8x96xf32> -> vector<8x96xf32>
    %c0_4 = arith.constant 0 : index
    %c0_5 = arith.constant 0 : index
    %6 = vector.load %arg5[%c0_4, %c0_5] : memref<1x96xf32, #tpu.memory_space<vmem>>, vector<1x96xf32>
    %7 = vector.broadcast %6 : vector<1x96xf32> to vector<8x96xf32>
    %8 = arith.addf %5, %7 : vector<8x96xf32>
    %9 = arith.truncf %8 : vector<8x96xf32> to vector<8x96xbf16>
    %c0_6 = arith.constant 0 : index
    %c0_7 = arith.constant 0 : index
    %c0_8 = arith.constant 0 : index
    %10 = vector.load %arg3[%c0_6, %c0_7, %c0_8] : memref<1x1x8xf32, #tpu.memory_space<vmem>>, vector<1x1x8xf32>
    %11 = vector.shape_cast %10 : vector<1x1x8xf32> to vector<1x8xf32>
    %12 = vector.extract_strided_slice %9 {offsets = [0, 32], sizes = [8, 32], strides = [1, 1]} : vector<8x96xbf16> to vector<8x32xbf16>
    %13 = tpu.transpose %12, [1, 0] : vector<8x32xbf16> -> vector<32x8xbf16>
    %14 = vector.extract_strided_slice %9 {offsets = [0, 0], sizes = [8, 8], strides = [1, 1]} : vector<8x96xbf16> to vector<8x8xbf16>
    %15 = vector.extract_strided_slice %13 {offsets = [0, 0], sizes = [8, 8], strides = [1, 1]} : vector<32x8xbf16> to vector<8x8xbf16>
    %16 = vector.extract_strided_slice %9 {offsets = [0, 64], sizes = [8, 8], strides = [1, 1]} : vector<8x96xbf16> to vector<8x8xbf16>
    %cst_9 = arith.constant dense<0.000000e+00> : vector<8x8xf32>
    %17 = tpu.matmul %14, %15, %cst_9 {dimension_numbers = #tpu.dot_dimension_numbers<[1], [0], [0], [1], [0, 0, 1, 1], [], []>} : vector<8x8xbf16>, vector<8x8xbf16>, vector<8x8xf32> -> vector<8x8xf32>
    %18 = vector.broadcast %11 : vector<1x8xf32> to vector<8x8xf32>
    %19 = arith.addf %17, %18 : vector<8x8xf32>
    %cst_10 = arith.constant dense<0xFF800000> : vector<8xf32>
    %20 = vector.multi_reduction <maximumf>, %19, %cst_10 [1] : vector<8x8xf32> to vector<8xf32>
    %21 = vector.shape_cast %20 : vector<8xf32> to vector<8x1xf32>
    %22 = vector.broadcast %21 : vector<8x1xf32> to vector<8x8xf32>
    %23 = arith.subf %19, %22 : vector<8x8xf32>
    %24 = math.exp %23 : vector<8x8xf32>
    %cst_11 = arith.constant dense<0.000000e+00> : vector<8xf32>
    %25 = vector.multi_reduction <add>, %24, %cst_11 [1] : vector<8x8xf32> to vector<8xf32>
    %26 = vector.shape_cast %25 : vector<8xf32> to vector<8x1xf32>
    %27 = tpu.reciprocal %26 {approx = true} : vector<8x1xf32> -> vector<8x1xf32>
    %28 = vector.broadcast %27 : vector<8x1xf32> to vector<8x8xf32>
    %29 = arith.mulf %24, %28 : vector<8x8xf32>
    %30 = arith.truncf %29 : vector<8x8xf32> to vector<8x8xbf16>
    %cst_12 = arith.constant dense<0.000000e+00> : vector<8x8xf32>
    %31 = tpu.matmul %30, %16, %cst_12 {dimension_numbers = #tpu.dot_dimension_numbers<[1], [0], [0], [1], [0, 0, 1, 1], [], []>} : vector<8x8xbf16>, vector<8x8xbf16>, vector<8x8xf32> -> vector<8x8xf32>
    %32 = arith.truncf %31 : vector<8x8xf32> to vector<8x8xbf16>
    %c0_13 = arith.constant 0 : index
    %c0_14 = arith.constant 0 : index
    %33 = vector.load %arg18[%c0_13, %c0_14] : memref<8x32xbf16, #tpu.memory_space<vmem>>, vector<8x8xbf16>
    tpu.vector_store %arg18[%c0_13, %c0_14], %32 {strides = array<i32>} : memref<8x32xbf16, #tpu.memory_space<vmem>>, vector<8x8xbf16>,
    %34 = vector.extract_strided_slice %9 {offsets = [0, 8], sizes = [8, 8], strides = [1, 1]} : vector<8x96xbf16> to vector<8x8xbf16>
    %35 = vector.extract_strided_slice %13 {offsets = [8, 0], sizes = [8, 8], strides = [1, 1]} : vector<32x8xbf16> to vector<8x8xbf16>
    %36 = vector.extract_strided_slice %9 {offsets = [0, 72], sizes = [8, 8], strides = [1, 1]} : vector<8x96xbf16> to vector<8x8xbf16>
    %cst_15 = arith.constant dense<0.000000e+00> : vector<8x8xf32>
    %37 = tpu.matmul %34, %35, %cst_15 {dimension_numbers = #tpu.dot_dimension_numbers<[1], [0], [0], [1], [0, 0, 1, 1], [], []>} : vector<8x8xbf16>, vector<8x8xbf16>, vector<8x8xf32> -> vector<8x8xf32>
    %38 = vector.broadcast %11 : vector<1x8xf32> to vector<8x8xf32>
    %39 = arith.addf %37, %38 : vector<8x8xf32>
    %cst_16 = arith.constant dense<0xFF800000> : vector<8xf32>
    %40 = vector.multi_reduction <maximumf>, %39, %cst_16 [1] : vector<8x8xf32> to vector<8xf32>
    %41 = vector.shape_cast %40 : vector<8xf32> to vector<8x1xf32>
    %42 = vector.broadcast %41 : vector<8x1xf32> to vector<8x8xf32>
    %43 = arith.subf %39, %42 : vector<8x8xf32>
    %44 = math.exp %43 : vector<8x8xf32>
    %cst_17 = arith.constant dense<0.000000e+00> : vector<8xf32>
    %45 = vector.multi_reduction <add>, %44, %cst_17 [1] : vector<8x8xf32> to vector<8xf32>
    %46 = vector.shape_cast %45 : vector<8xf32> to vector<8x1xf32>
    %47 = tpu.reciprocal %46 {approx = true} : vector<8x1xf32> -> vector<8x1xf32>
    %48 = vector.broadcast %47 : vector<8x1xf32> to vector<8x8xf32>
    %49 = arith.mulf %44, %48 : vector<8x8xf32>
    %50 = arith.truncf %49 : vector<8x8xf32> to vector<8x8xbf16>
    %cst_18 = arith.constant dense<0.000000e+00> : vector<8x8xf32>
    %51 = tpu.matmul %50, %36, %cst_18 {dimension_numbers = #tpu.dot_dimension_numbers<[1], [0], [0], [1], [0, 0, 1, 1], [], []>} : vector<8x8xbf16>, vector<8x8xbf16>, vector<8x8xf32> -> vector<8x8xf32>
    %52 = arith.truncf %51 : vector<8x8xf32> to vector<8x8xbf16>
    %c0_19 = arith.constant 0 : index
    %c8 = arith.constant 8 : index
    %53 = vector.load %arg18[%c0_19, %c8] : memref<8x32xbf16, #tpu.memory_space<vmem>>, vector<8x8xbf16>
    tpu.vector_store %arg18[%c0_19, %c8], %52 {strides = array<i32>} : memref<8x32xbf16, #tpu.memory_space<vmem>>, vector<8x8xbf16>,
    %54 = vector.extract_strided_slice %9 {offsets = [0, 16], sizes = [8, 8], strides = [1, 1]} : vector<8x96xbf16> to vector<8x8xbf16>
    %55 = vector.extract_strided_slice %13 {offsets = [16, 0], sizes = [8, 8], strides = [1, 1]} : vector<32x8xbf16> to vector<8x8xbf16>
    %56 = vector.extract_strided_slice %9 {offsets = [0, 80], sizes = [8, 8], strides = [1, 1]} : vector<8x96xbf16> to vector<8x8xbf16>
    %cst_20 = arith.constant dense<0.000000e+00> : vector<8x8xf32>
    %57 = tpu.matmul %54, %55, %cst_20 {dimension_numbers = #tpu.dot_dimension_numbers<[1], [0], [0], [1], [0, 0, 1, 1], [], []>} : vector<8x8xbf16>, vector<8x8xbf16>, vector<8x8xf32> -> vector<8x8xf32>
    %58 = vector.broadcast %11 : vector<1x8xf32> to vector<8x8xf32>
    %59 = arith.addf %57, %58 : vector<8x8xf32>
    %cst_21 = arith.constant dense<0xFF800000> : vector<8xf32>
    %60 = vector.multi_reduction <maximumf>, %59, %cst_21 [1] : vector<8x8xf32> to vector<8xf32>
    %61 = vector.shape_cast %60 : vector<8xf32> to vector<8x1xf32>
    %62 = vector.broadcast %61 : vector<8x1xf32> to vector<8x8xf32>
    %63 = arith.subf %59, %62 : vector<8x8xf32>
    %64 = math.exp %63 : vector<8x8xf32>
    %cst_22 = arith.constant dense<0.000000e+00> : vector<8xf32>
    %65 = vector.multi_reduction <add>, %64, %cst_22 [1] : vector<8x8xf32> to vector<8xf32>
    %66 = vector.shape_cast %65 : vector<8xf32> to vector<8x1xf32>
    %67 = tpu.reciprocal %66 {approx = true} : vector<8x1xf32> -> vector<8x1xf32>
    %68 = vector.broadcast %67 : vector<8x1xf32> to vector<8x8xf32>
    %69 = arith.mulf %64, %68 : vector<8x8xf32>
    %70 = arith.truncf %69 : vector<8x8xf32> to vector<8x8xbf16>
    %cst_23 = arith.constant dense<0.000000e+00> : vector<8x8xf32>
    %71 = tpu.matmul %70, %56, %cst_23 {dimension_numbers = #tpu.dot_dimension_numbers<[1], [0], [0], [1], [0, 0, 1, 1], [], []>} : vector<8x8xbf16>, vector<8x8xbf16>, vector<8x8xf32> -> vector<8x8xf32>
    %72 = arith.truncf %71 : vector<8x8xf32> to vector<8x8xbf16>
    %c0_24 = arith.constant 0 : index
    %c16 = arith.constant 16 : index
    %73 = vector.load %arg18[%c0_24, %c16] : memref<8x32xbf16, #tpu.memory_space<vmem>>, vector<8x8xbf16>
    tpu.vector_store %arg18[%c0_24, %c16], %72 {strides = array<i32>} : memref<8x32xbf16, #tpu.memory_space<vmem>>, vector<8x8xbf16>,
    %74 = vector.extract_strided_slice %9 {offsets = [0, 24], sizes = [8, 8], strides = [1, 1]} : vector<8x96xbf16> to vector<8x8xbf16>
    %75 = vector.extract_strided_slice %13 {offsets = [24, 0], sizes = [8, 8], strides = [1, 1]} : vector<32x8xbf16> to vector<8x8xbf16>
    %76 = vector.extract_strided_slice %9 {offsets = [0, 88], sizes = [8, 8], strides = [1, 1]} : vector<8x96xbf16> to vector<8x8xbf16>
    %cst_25 = arith.constant dense<0.000000e+00> : vector<8x8xf32>
    %77 = tpu.matmul %74, %75, %cst_25 {dimension_numbers = #tpu.dot_dimension_numbers<[1], [0], [0], [1], [0, 0, 1, 1], [], []>} : vector<8x8xbf16>, vector<8x8xbf16>, vector<8x8xf32> -> vector<8x8xf32>
    %78 = vector.broadcast %11 : vector<1x8xf32> to vector<8x8xf32>
    %79 = arith.addf %77, %78 : vector<8x8xf32>
    %cst_26 = arith.constant dense<0xFF800000> : vector<8xf32>
    %80 = vector.multi_reduction <maximumf>, %79, %cst_26 [1] : vector<8x8xf32> to vector<8xf32>
    %81 = vector.shape_cast %80 : vector<8xf32> to vector<8x1xf32>
    %82 = vector.broadcast %81 : vector<8x1xf32> to vector<8x8xf32>
    %83 = arith.subf %79, %82 : vector<8x8xf32>
    %84 = math.exp %83 : vector<8x8xf32>
    %cst_27 = arith.constant dense<0.000000e+00> : vector<8xf32>
    %85 = vector.multi_reduction <add>, %84, %cst_27 [1] : vector<8x8xf32> to vector<8xf32>
    %86 = vector.shape_cast %85 : vector<8xf32> to vector<8x1xf32>
    %87 = tpu.reciprocal %86 {approx = true} : vector<8x1xf32> -> vector<8x1xf32>
    %88 = vector.broadcast %87 : vector<8x1xf32> to vector<8x8xf32>
    %89 = arith.mulf %84, %88 : vector<8x8xf32>
    %90 = arith.truncf %89 : vector<8x8xf32> to vector<8x8xbf16>
    %cst_28 = arith.constant dense<0.000000e+00> : vector<8x8xf32>
    %91 = tpu.matmul %90, %76, %cst_28 {dimension_numbers = #tpu.dot_dimension_numbers<[1], [0], [0], [1], [0, 0, 1, 1], [], []>} : vector<8x8xbf16>, vector<8x8xbf16>, vector<8x8xf32> -> vector<8x8xf32>
    %92 = arith.truncf %91 : vector<8x8xf32> to vector<8x8xbf16>
    %c0_29 = arith.constant 0 : index
    %c24 = arith.constant 24 : index
    %93 = vector.load %arg18[%c0_29, %c24] : memref<8x32xbf16, #tpu.memory_space<vmem>>, vector<8x8xbf16>
    tpu.vector_store %arg18[%c0_29, %c24], %92 {strides = array<i32>} : memref<8x32xbf16, #tpu.memory_space<vmem>>, vector<8x8xbf16>,
    %c0_30 = arith.constant 0 : index
    %c0_31 = arith.constant 0 : index
    %94 = vector.load %arg18[%c0_30, %c0_31] : memref<8x32xbf16, #tpu.memory_space<vmem>>, vector<8x32xbf16>
    %c0_32 = arith.constant 0 : index
    %c0_33 = arith.constant 0 : index
    %95 = vector.load %arg6[%c0_32, %c0_33] : memref<32x32xbf16, #tpu.memory_space<vmem>>, vector<32x32xbf16>
    %cst_34 = arith.constant dense<0.000000e+00> : vector<8x32xf32>
    %96 = tpu.matmul %94, %95, %cst_34 {dimension_numbers = #tpu.dot_dimension_numbers<[1], [0], [0], [1], [0, 0, 1, 1], [], []>} : vector<8x32xbf16>, vector<32x32xbf16>, vector<8x32xf32> -> vector<8x32xf32>
    %c0_35 = arith.constant 0 : index
    %c0_36 = arith.constant 0 : index
    %97 = vector.load %arg7[%c0_35, %c0_36] : memref<1x32xf32, #tpu.memory_space<vmem>>, vector<1x32xf32>
    %98 = vector.broadcast %97 : vector<1x32xf32> to vector<8x32xf32>
    %99 = arith.addf %96, %98 : vector<8x32xf32>
    %100 = arith.extf %3 : vector<8x32xbf16> to vector<8x32xf32>
    %101 = arith.addf %99, %100 : vector<8x32xf32>
    %c0_37 = arith.constant 0 : index
    %c0_38 = arith.constant 0 : index
    %102 = vector.load %arg8[%c0_37, %c0_38] : memref<1x32xf32, #tpu.memory_space<vmem>>, vector<1x32xf32>
    %c0_39 = arith.constant 0 : index
    %c0_40 = arith.constant 0 : index
    %103 = vector.load %arg9[%c0_39, %c0_40] : memref<1x32xf32, #tpu.memory_space<vmem>>, vector<1x32xf32>
    %cst_41 = arith.constant dense<0.000000e+00> : vector<8xf32>
    %104 = vector.multi_reduction <add>, %101, %cst_41 [1] : vector<8x32xf32> to vector<8xf32>
    %105 = vector.shape_cast %104 : vector<8xf32> to vector<8x1xf32>
    %cst_42 = arith.constant 3.200000e+01 : f32
    %106 = vector.broadcast %cst_42 : f32 to vector<8x1xf32>
    %107 = arith.divf %105, %106 : vector<8x1xf32>
    %108 = vector.broadcast %107 : vector<8x1xf32> to vector<8x32xf32>
    %109 = arith.subf %101, %108 : vector<8x32xf32>
    %110 = arith.mulf %109, %109 : vector<8x32xf32>
    %cst_43 = arith.constant dense<0.000000e+00> : vector<8xf32>
    %111 = vector.multi_reduction <add>, %110, %cst_43 [1] : vector<8x32xf32> to vector<8xf32>
    %112 = vector.shape_cast %111 : vector<8xf32> to vector<8x1xf32>
    %cst_44 = arith.constant 3.200000e+01 : f32
    %113 = vector.broadcast %cst_44 : f32 to vector<8x1xf32>
    %114 = arith.divf %112, %113 : vector<8x1xf32>
    %115 = vector.broadcast %107 : vector<8x1xf32> to vector<8x32xf32>
    %116 = arith.subf %101, %115 : vector<8x32xf32>
    %cst_45 = arith.constant 9.99999996E-13 : f32
    %117 = vector.broadcast %cst_45 : f32 to vector<8x1xf32>
    %118 = arith.addf %114, %117 : vector<8x1xf32>
    %119 = math.rsqrt %118 : vector<8x1xf32>
    %120 = vector.broadcast %119 : vector<8x1xf32> to vector<8x32xf32>
    %121 = arith.mulf %116, %120 : vector<8x32xf32>
    %122 = vector.broadcast %102 : vector<1x32xf32> to vector<8x32xf32>
    %123 = arith.mulf %121, %122 : vector<8x32xf32>
    %124 = vector.broadcast %103 : vector<1x32xf32> to vector<8x32xf32>
    %125 = arith.addf %123, %124 : vector<8x32xf32>
    %126 = arith.truncf %125 : vector<8x32xf32> to vector<8x32xbf16>
    %c0_46 = arith.constant 0 : index
    %c0_47 = arith.constant 0 : index
    %127 = vector.load %arg10[%c0_46, %c0_47] : memref<32x64xbf16, #tpu.memory_space<vmem>>, vector<32x64xbf16>
    %cst_48 = arith.constant dense<0.000000e+00> : vector<8x64xf32>
    %128 = tpu.matmul %126, %127, %cst_48 {dimension_numbers = #tpu.dot_dimension_numbers<[1], [0], [0], [1], [0, 0, 1, 1], [], []>} : vector<8x32xbf16>, vector<32x64xbf16>, vector<8x64xf32> -> vector<8x64xf32>
    %c0_49 = arith.constant 0 : index
    %c0_50 = arith.constant 0 : index
    %129 = vector.load %arg11[%c0_49, %c0_50] : memref<1x64xf32, #tpu.memory_space<vmem>>, vector<1x64xf32>
    %130 = vector.broadcast %129 : vector<1x64xf32> to vector<8x64xf32>
    %131 = arith.addf %128, %130 : vector<8x64xf32>
    %cst_51 = arith.constant 5.000000e-01 : f32
    %132 = vector.broadcast %cst_51 : f32 to vector<8x64xf32>
    %133 = arith.mulf %132, %131 : vector<8x64xf32>
    %cst_52 = arith.constant 4.471500e-02 : f32
    %134 = vector.broadcast %cst_52 : f32 to vector<8x64xf32>
    %135 = arith.mulf %134, %131 : vector<8x64xf32>
    %136 = arith.mulf %135, %131 : vector<8x64xf32>
    %137 = arith.mulf %136, %131 : vector<8x64xf32>
    %138 = arith.addf %131, %137 : vector<8x64xf32>
    %cst_53 = arith.constant 0.797884583 : f32
    %139 = vector.broadcast %cst_53 : f32 to vector<8x64xf32>
    %140 = arith.mulf %139, %138 : vector<8x64xf32>
    %141 = math.tanh %140 : vector<8x64xf32>
    %cst_54 = arith.constant 1.000000e+00 : f32
    %142 = vector.broadcast %cst_54 : f32 to vector<8x64xf32>
    %143 = arith.addf %142, %141 : vector<8x64xf32>
    %144 = arith.mulf %133, %143 : vector<8x64xf32>
    %145 = arith.truncf %144 : vector<8x64xf32> to vector<8x64xbf16>
    %c0_55 = arith.constant 0 : index
    %c0_56 = arith.constant 0 : index
    %146 = vector.load %arg12[%c0_55, %c0_56] : memref<64x32xbf16, #tpu.memory_space<vmem>>, vector<64x32xbf16>
    %cst_57 = arith.constant dense<0.000000e+00> : vector<8x32xf32>
    %147 = tpu.matmul %145, %146, %cst_57 {dimension_numbers = #tpu.dot_dimension_numbers<[1], [0], [0], [1], [0, 0, 1, 1], [], []>} : vector<8x64xbf16>, vector<64x32xbf16>, vector<8x32xf32> -> vector<8x32xf32>
    %c0_58 = arith.constant 0 : index
    %c0_59 = arith.constant 0 : index
    %148 = vector.load %arg13[%c0_58, %c0_59] : memref<1x32xf32, #tpu.memory_space<vmem>>, vector<1x32xf32>
    %149 = vector.broadcast %148 : vector<1x32xf32> to vector<8x32xf32>
    %150 = arith.addf %147, %149 : vector<8x32xf32>
    %151 = arith.addf %150, %125 : vector<8x32xf32>
    %c0_60 = arith.constant 0 : index
    %c0_61 = arith.constant 0 : index
    %152 = vector.load %arg14[%c0_60, %c0_61] : memref<1x32xf32, #tpu.memory_space<vmem>>, vector<1x32xf32>
    %c0_62 = arith.constant 0 : index
    %c0_63 = arith.constant 0 : index
    %153 = vector.load %arg15[%c0_62, %c0_63] : memref<1x32xf32, #tpu.memory_space<vmem>>, vector<1x32xf32>
    %cst_64 = arith.constant dense<0.000000e+00> : vector<8xf32>
    %154 = vector.multi_reduction <add>, %151, %cst_64 [1] : vector<8x32xf32> to vector<8xf32>
    %155 = vector.shape_cast %154 : vector<8xf32> to vector<8x1xf32>
    %cst_65 = arith.constant 3.200000e+01 : f32
    %156 = vector.broadcast %cst_65 : f32 to vector<8x1xf32>
    %157 = arith.divf %155, %156 : vector<8x1xf32>
    %158 = vector.broadcast %157 : vector<8x1xf32> to vector<8x32xf32>
    %159 = arith.subf %151, %158 : vector<8x32xf32>
    %160 = arith.mulf %159, %159 : vector<8x32xf32>
    %cst_66 = arith.constant dense<0.000000e+00> : vector<8xf32>
    %161 = vector.multi_reduction <add>, %160, %cst_66 [1] : vector<8x32xf32> to vector<8xf32>
    %162 = vector.shape_cast %161 : vector<8xf32> to vector<8x1xf32>
    %cst_67 = arith.constant 3.200000e+01 : f32
    %163 = vector.broadcast %cst_67 : f32 to vector<8x1xf32>
    %164 = arith.divf %162, %163 : vector<8x1xf32>
    %165 = vector.broadcast %157 : vector<8x1xf32> to vector<8x32xf32>
    %166 = arith.subf %151, %165 : vector<8x32xf32>
    %cst_68 = arith.constant 9.99999996E-13 : f32
    %167 = vector.broadcast %cst_68 : f32 to vector<8x1xf32>
    %168 = arith.addf %164, %167 : vector<8x1xf32>
    %169 = math.rsqrt %168 : vector<8x1xf32>
    %170 = vector.broadcast %169 : vector<8x1xf32> to vector<8x32xf32>
    %171 = arith.mulf %166, %170 : vector<8x32xf32>
    %172 = vector.broadcast %152 : vector<1x32xf32> to vector<8x32xf32>
    %173 = arith.mulf %171, %172 : vector<8x32xf32>
    %174 = vector.broadcast %153 : vector<1x32xf32> to vector<8x32xf32>
    %175 = arith.addf %173, %174 : vector<8x32xf32>
    %176 = arith.truncf %175 : vector<8x32xf32> to vector<8x32xbf16>
    %c0_69 = arith.constant 0 : index
    %c0_70 = arith.constant 0 : index
    %177 = vector.load %arg17[%c0_69, %c0_70] : memref<8x32xbf16, #tpu.memory_space<vmem>>, vector<8x32xbf16>
    tpu.vector_store %arg17[%c0_69, %c0_70], %176 {strides = array<i32>} : memref<8x32xbf16, #tpu.memory_space<vmem>>, vector<8x32xbf16>,
    %c1_i32 = arith.constant 1 : i32
    %178 = arith.cmpi eq, %arg1, %c1_i32 : i32
    %179 = arith.extui %178 : i1 to i32
    %c0_i32_71 = arith.constant 0 : i32
    %180 = arith.cmpi ne, %179, %c0_i32_71 : i32
    scf.if %180 {
      %181 = vector.extract_strided_slice %176 {offsets = [0, 0], sizes = [1, 32], strides = [1, 1]} : vector<8x32xbf16> to vector<1x32xbf16>
      %c0_72 = arith.constant 0 : index
      %c0_73 = arith.constant 0 : index
      %c0_74 = arith.constant 0 : index
      %182 = vector.load %arg16[%c0_72, %c0_73, %c0_74] : memref<1x1x32xbf16, #tpu.memory_space<vmem>>, vector<1x1x32xbf16>
      %183 = vector.shape_cast %182 : vector<1x1x32xbf16> to vector<1x32xbf16>
      %184 = vector.shape_cast %181 : vector<1x32xbf16> to vector<1x1x32xbf16>
      tpu.vector_store %arg16[%c0_72, %c0_73, %c0_74], %184 {strides = array<i32>} : memref<1x1x32xbf16, #tpu.memory_space<vmem>>, vector<1x1x32xbf16>,
    } else {
    }
    return
  }
  func.func @transform_0(%arg0: i32, %arg1: i32) -> (i32, i32, i32) {
    %c0_i32 = arith.constant 0 : i32
    %c0_i32_0 = arith.constant 0 : i32
    %c0_i32_1 = arith.constant 0 : i32
    return %arg0, %c0_i32, %c0_i32_0 : i32, i32, i32
  }
  func.func @transform_1(%arg0: i32, %arg1: i32) -> (i32, i32, i32) {
    %c0_i32 = arith.constant 0 : i32
    %c0_i32_0 = arith.constant 0 : i32
    %c0_i32_1 = arith.constant 0 : i32
    return %arg0, %c0_i32, %c0_i32_0 : i32, i32, i32
  }
  func.func @transform_2(%arg0: i32, %arg1: i32) -> (i32, i32) {
    %c0_i32 = arith.constant 0 : i32
    %c0_i32_0 = arith.constant 0 : i32
    %c0_i32_1 = arith.constant 0 : i32
    return %c0_i32, %c0_i32_0 : i32, i32
  }
  func.func @transform_3(%arg0: i32, %arg1: i32) -> (i32, i32) {
    %c0_i32 = arith.constant 0 : i32
    %c0_i32_0 = arith.constant 0 : i32
    %c0_i32_1 = arith.constant 0 : i32
    return %c0_i32, %c0_i32_0 : i32, i32
  }
  func.func @transform_4(%arg0: i32, %arg1: i32) -> (i32, i32) {
    %c0_i32 = arith.constant 0 : i32
    %c0_i32_0 = arith.constant 0 : i32
    %c0_i32_1 = arith.constant 0 : i32
    return %c0_i32, %c0_i32_0 : i32, i32
  }
  func.func @transform_5(%arg0: i32, %arg1: i32) -> (i32, i32) {
    %c0_i32 = arith.constant 0 : i32
    %c0_i32_0 = arith.constant 0 : i32
    %c0_i32_1 = arith.constant 0 : i32
    return %c0_i32, %c0_i32_0 : i32, i32
  }
  func.func @transform_6(%arg0: i32, %arg1: i32) -> (i32, i32) {
    %c0_i32 = arith.constant 0 : i32
    %c0_i32_0 = arith.constant 0 : i32
    %c0_i32_1 = arith.constant 0 : i32
    return %c0_i32, %c0_i32_0 : i32, i32
  }
  func.func @transform_7(%arg0: i32, %arg1: i32) -> (i32, i32) {
    %c0_i32 = arith.constant 0 : i32
    %c0_i32_0 = arith.constant 0 : i32
    %c0_i32_1 = arith.constant 0 : i32
    return %c0_i32, %c0_i32_0 : i32, i32
  }
  func.func @transform_8(%arg0: i32, %arg1: i32) -> (i32, i32) {
    %c0_i32 = arith.constant 0 : i32
    %c0_i32_0 = arith.constant 0 : i32
    %c0_i32_1 = arith.constant 0 : i32
    return %c0_i32, %c0_i32_0 : i32, i32
  }
  func.func @transform_9(%arg0: i32, %arg1: i32) -> (i32, i32) {
    %c0_i32 = arith.constant 0 : i32
    %c0_i32_0 = arith.constant 0 : i32
    %c0_i32_1 = arith.constant 0 : i32
    return %c0_i32, %c0_i32_0 : i32, i32
  }
  func.func @transform_10(%arg0: i32, %arg1: i32) -> (i32, i32) {
    %c0_i32 = arith.constant 0 : i32
    %c0_i32_0 = arith.constant 0 : i32
    %c0_i32_1 = arith.constant 0 : i32
    return %c0_i32, %c0_i32_0 : i32, i32
  }
  func.func @transform_11(%arg0: i32, %arg1: i32) -> (i32, i32) {
    %c0_i32 = arith.constant 0 : i32
    %c0_i32_0 = arith.constant 0 : i32
    %c0_i32_1 = arith.constant 0 : i32
    return %c0_i32, %c0_i32_0 : i32, i32
  }
  func.func @transform_12(%arg0: i32, %arg1: i32) -> (i32, i32) {
    %c0_i32 = arith.constant 0 : i32
    %c0_i32_0 = arith.constant 0 : i32
    %c0_i32_1 = arith.constant 0 : i32
    return %c0_i32, %c0_i32_0 : i32, i32
  }
  func.func @transform_13(%arg0: i32, %arg1: i32) -> (i32, i32) {
    %c0_i32 = arith.constant 0 : i32
    %c0_i32_0 = arith.constant 0 : i32
    %c0_i32_1 = arith.constant 0 : i32
    return %c0_i32, %c0_i32_0 : i32, i32
  }
  func.func @transform_14(%arg0: i32, %arg1: i32) -> (i32, i32, i32) {
    %c0_i32 = arith.constant 0 : i32
    %c0_i32_0 = arith.constant 0 : i32
    %c0_i32_1 = arith.constant 0 : i32
    return %arg0, %c0_i32, %c0_i32_0 : i32, i32, i32
  }
}

</mosaic_0001>

<bundles_post_ra>
// kernel: classification_albert_forward.5
= control target key start
LH: loop header
LB: loop body
LE: loop exit
PB: predicated region body
PF: predicated region fallthrough
CT: control target
= control target key end

     0   :  { %vm19_vm0 = vcmask 261120   ;;  %v95_v1 = vmov 0.0   ;;  %vm39_vm1 = vcmask 130048   ;;  %vm75_vm2 = vcmask 257024   ;;  %s135_s1 = inlined_call_operand.vmem [shape: bf16[16,32], index: 1, kind: input, shape index: {}]   ;;  %s136_s0 = inlined_call_operand.vmem [shape: bf16[16,16], index: 0, kind: input, shape index: {}]   ;;  %s137_s2 = inlined_call_operand.vmem [shape: f32[1,32], index: 2, kind: input, shape index: {}]   ;;  %s138_s3 = inlined_call_operand.vmem [shape: bf16[16,32], index: 3, kind: output, shape index: {}]  }
   0x1   :  { %v92_v0 = vld [vmem:[%s135_s1] sm:$0xff]  ;;  %20 = vst.msk [vmem:[#allocation2] sm:$0xff] %vm19_vm0, %v95_v1 }
   0x2   :  { %v91_v2 = vld [vmem:[%s136_s0] sm:$0xff]  ;;  %21 = vst.msk [vmem:[#allocation2 + $0x8] sm:$0xff] %vm19_vm0, %v95_v1  ;;  %50 = vmatpush.bf16.msra.mxu0 %v92_v0 }
   0x3   :  { %v94_v7 = vld [vmem:[%s137_s2] ss:$0 sm:$0xff] }
   0x5   :  { %90 = vmatmul.msk.bf16.vlgmr.msra.gmra.mxu0 %vm39_vm1, %v91_v2 }
   0x8   :  { %v22_v3 = vld [vmem:[#allocation2] sm:$0xff] }
   0x9   :  { %v23_v6 = vld [vmem:[#allocation2 + $0x8] sm:$0xff] }
  0x82   :  { %v52_v4 = vpop.f32.mrf.mxu0 }
  0x83   :  { %v57_v5 = vadd.f32 %v52_v4, %v22_v3 }
  0x85   :  { %60 = vst.msk [vmem:[#allocation2] sm:$0xff] %vm19_vm0, %v57_v5 }
  0x8a   :  { %v54_v8 = vpop.f32.mrf.mxu0 }
  0x8b   :  { %v58_v9 = vadd.f32 %v54_v8, %v23_v6 }
  0x8c   :  { %v65_v10 = vld [vmem:[#allocation2] sm:$0xff] }
  0x8d   :  { %v71_v11 = vadd.f32 %v94_v7, %v65_v10  ;;  %61 = vst.msk [vmem:[#allocation2 + $0x8] sm:$0xff] %vm19_vm0, %v58_v9 }
  0x8f   :  { %v73_v12 = vpack.c.bf16 %v71_v11, %v71_v11 }
  0x91   :  { %76 = vst.msk [vmem:[%s138_s3] sm:$0xf] %vm75_vm2, %v73_v12 }
  0x94   :  { %v66_v13 = vld [vmem:[#allocation2 + $0x8] sm:$0xff] }
  0x95   :  { %v72_v14 = vadd.f32 %v94_v7, %v66_v13 }
  0x97   :  { %v74_v15 = vpack.c.bf16 %v72_v14, %v72_v14 }
  0x99   :  { %77 = vst.msk [vmem:[%s138_s3 + $0x4] sm:$0xf] %vm75_vm2, %v74_v15 }

// kernel: classification_albert_forward.4
= control target key start
LH: loop header
LB: loop body
LE: loop exit
PB: predicated region body
PF: predicated region fallthrough
CT: control target
= control target key end

     0   :  { %vm18_vm0 = vcmask 130048   ;;  %v98_v4 = vmov 16.0   ;;  %vm82_vm6 = vcmask 125952   ;;  %s141_s0 = inlined_call_operand.vmem [shape: f32[16,16], index: 0, kind: input, shape index: {}]   ;;  %s142_s1 = inlined_call_operand.vmem [shape: f32[1,16], index: 1, kind: input, shape index: {}]   ;;  %s143_s2 = inlined_call_operand.vmem [shape: f32[1,16], index: 2, kind: input, shape index: {}]   ;;  %s144_s3 = inlined_call_operand.vmem [shape: bf16[16,16], index: 3, kind: output, shape index: {}]  }
   0x1   :  { %v14_v0 = vld [vmem:[%s141_s0] sm:$0xff]  ;;  %v15_v2 = vld [vmem:[%s141_s0 + $0x8] sm:$0xff]  ;;  %92 = vrcp.f32 %v98_v4 }
   0x2   :  { %v19_v1 = vsel %vm18_vm0, %v14_v0, 0.0  ;;  %v22_v3 = vsel %vm18_vm0, %v15_v2, 0.0  ;;  %v90_v35 = vld [vmem:[%s142_s1] ss:$0 sm:$0xff] }
   0x3   :  { %20 = vadd.xlane.f32.xlu0 %v19_v1  ;;  %v91_v38 = vld [vmem:[%s143_s2] ss:$0 sm:$0xff] }
   0x7   :  { %v93_v5 = vpop.eup %92 }
   0x8   :  { %v26_v6 = vmul.f32 16.0, %v93_v5  ;;  %vm30_vm1 = vweird.f32 %v93_v5 }
   0xa   :  { %v27_v7 = vsub.f32 1.0, %v26_v6 }
   0xb   :  { %23 = vadd.xlane.f32.xlu0 %v22_v3 }
   0xc   :  { %v28_v8 = vmul.f32 %v93_v5, %v27_v7 }
   0xe   :  { %v29_v9 = vadd.f32 %v93_v5, %v28_v8 }
  0x10   :  { %v31_v10 = vsel %vm30_vm1, %v93_v5, %v29_v9 }
  0x76   :  { %v21_v11 = vpop.xlane.xlu0 %20 }
  0x77   :  { %v32_v12 = vmul.f32 %v31_v10, %v21_v11 }
  0x79   :  { %v34_v13 = vsub.f32 %v14_v0, %v32_v12 }
  0x7b   :  { %v36_v14 = vmul.f32 %v34_v13, %v34_v13 }
  0x7d   :  { %v38_v15 = vsel %vm18_vm0, %v36_v14, 0.0 }
  0x7e   :  { %39 = vadd.xlane.f32.xlu1 %v38_v15  ;;  %v24_v16 = vpop.xlane.xlu0 %23 }
  0x7f   :  { %v33_v17 = vmul.f32 %v31_v10, %v24_v16 }
  0x81   :  { %v35_v18 = vsub.f32 %v15_v2, %v33_v17 }
  0x83   :  { %v37_v19 = vmul.f32 %v35_v18, %v35_v18 }
  0x85   :  { %v41_v20 = vsel %vm18_vm0, %v37_v19, 0.0 }
  0x86   :  { %42 = vadd.xlane.f32.xlu1 %v41_v20 }
  0xf1   :  { %v40_v21 = vpop.xlane.xlu1 %39 }
  0xf2   :  { %v44_v22 = vmul.f32 %v40_v21, %v31_v10 }
  0xf4   :  { %v46_v23 = vadd.f32 1e-12, %v44_v22 }
  0xf6   :  { %94 = vrsqrt.f32 %v46_v23  ;;  %vm54_vm3 = vweird.f32 %v46_v23 }
  0xf9   :  { %v43_v24 = vpop.xlane.xlu1 %42 }
  0xfa   :  { %v45_v25 = vmul.f32 %v43_v24, %v31_v10 }
  0xfc   :  { %v95_v26 = vpop.eup %94  ;;  %v47_v27 = vadd.f32 1e-12, %v45_v25 }
  0xfd   :  { %v49_v28 = vmul.f32 %v95_v26, %v46_v23  ;;  %vm55_vm2 = vweird.f32 %v95_v26 }
  0xfe   :  { %96 = vrsqrt.f32 %v47_v27  ;;  %vm56_vm4 = vmor %vm54_vm3, %vm55_vm2  ;;  %vm64_vm7 = vweird.f32 %v47_v27 }
  0xff   :  { %v50_v29 = vmul.f32 %v95_v26, %v49_v28 }
 0x101   :  { %v51_v30 = vmul.f32 0.5, %v50_v29 }
 0x103   :  { %v52_v31 = vsub.f32 1.5, %v51_v30 }
 0x104   :  { %v97_v32 = vpop.eup %96 }
 0x105   :  { %v53_v33 = vmul.f32 %v95_v26, %v52_v31  ;;  %v59_v34 = vmul.f32 %v97_v32, %v47_v27  ;;  %vm65_vm5 = vweird.f32 %v97_v32 }
 0x106   :  { %vm66_vm8 = vmor %vm64_vm7, %vm65_vm5 }
 0x107   :  { %v57_v36 = vsel %vm56_vm4, %v95_v26, %v53_v33  ;;  %v60_v37 = vmul.f32 %v97_v32, %v59_v34 }
 0x108   :  { %v68_v39 = vmul.f32 %v57_v36, %v34_v13 }
 0x109   :  { %v61_v40 = vmul.f32 0.5, %v60_v37 }
 0x10a   :  { %v73_v41 = vmul.f32 %v90_v35, %v68_v39 }
 0x10b   :  { %v62_v42 = vsub.f32 1.5, %v61_v40 }
 0x10c   :  { %v78_v43 = vadd.f32 %v91_v38, %v73_v41 }
 0x10d   :  { %v63_v44 = vmul.f32 %v97_v32, %v62_v42 }
 0x10e   :  { %v80_v45 = vpack.c.bf16 %v78_v43, %v78_v43 }
 0x10f   :  { %v67_v46 = vsel %vm66_vm8, %v97_v32, %v63_v44 }
 0x110   :  { %83 = vst.msk [vmem:[%s144_s3] sm:$0xf] %vm82_vm6, %v80_v45  ;;  %v69_v47 = vmul.f32 %v67_v46, %v35_v18 }
 0x112   :  { %v74_v48 = vmul.f32 %v90_v35, %v69_v47 }
 0x114   :  { %v79_v49 = vadd.f32 %v91_v38, %v74_v48 }
 0x116   :  { %v81_v50 = vpack.c.bf16 %v79_v49, %v79_v49 }
 0x118   :  { %84 = vst.msk [vmem:[%s144_s3 + $0x4] sm:$0xf] %vm82_vm6, %v81_v50 }

// kernel: classification_albert_forward.7
= control target key start
LH: loop header
LB: loop body
LE: loop exit
PB: predicated region body
PF: predicated region fallthrough
CT: control target
= control target key end

     0   :  { %s587_s0 = inlined_call_operand.vmem [shape: bf16[2,32], index: 0, kind: input, shape index: {}]   ;;  %s588_s1 = inlined_call_operand.vmem [shape: bf16[32,32], index: 1, kind: input, shape index: {}]   ;;  %s589_s2 = inlined_call_operand.vmem [shape: f32[1,32], index: 2, kind: input, shape index: {}]   ;;  %s590_s3 = inlined_call_operand.vmem [shape: bf16[32,256], index: 3, kind: input, shape index: {}]   ;;  %s591_s4 = inlined_call_operand.vmem [shape: f32[1,256], index: 4, kind: input, shape index: {}]   ;;  %s592_s5 = inlined_call_operand.vmem [shape: bf16[256,128], index: 5, kind: input, shape index: {}]   ;;  %s593_s6 = inlined_call_operand.vmem [shape: f32[1,128], index: 6, kind: input, shape index: {}]   ;;  %s594_s7 = inlined_call_operand.hbm [shape: f32[2,128], index: 7, kind: output, shape index: {}]  }
   0x1   :  { %v398_v0 = vld [vmem:[%s588_s1 + $0x8] sm:$0xff]  ;;  %v325_v1 = vld [vmem:[%s590_s3 + $0x10] sm:$0xf]  ;;  %v402_v2 = vld [vmem:[%s590_s3 + $0x14] sm:$0xf0] }
   0x2   :  { %59 = vmatpush.bf16.msra.mxu1 %v398_v0  ;;  %v397_v3 = vld [vmem:[%s588_s1] sm:$0xff] }
   0x3   :  { %12 = vsyncpa [#allocation3], 0  ;;  %v326_v4 = vor.u32 %v402_v2, %v325_v1  ;;  %v28_v5 = vld [vmem:[%s587_s0] sm:$0x1]  ;;  %vm49_vm0 = vcmask 261120   ;;  %v410_v15 = vld [vmem:[%s592_s5 + $0x38] sm:$0xff] }
   0x4   :  { %v401_v6 = vld [vmem:[%s590_s3 + $0x14] sm:$0xf]  ;;  %v327_v7 = vld [vmem:[%s590_s3 + $0x18] sm:$0xf0]  ;;  %v317_v9 = vld [vmem:[%s590_s3] sm:$0xf]  ;;  %263 = vmatpush.bf16.msra.mxu3 %v410_v15 }
   0x5   :  { %v330_v8 = vor.u32 %v401_v6, %v327_v7  ;;  %v400_v10 = vld [vmem:[%s590_s3 + $0x4] sm:$0xf0]  ;;  %v399_v11 = vld [vmem:[%s590_s3 + $0x4] sm:$0xf]  ;;  %v319_v13 = vld [vmem:[%s590_s3 + $0x8] sm:$0xf0] }
   0x6   :  { %60 = vmatpush.bf16.msra.mxu1 %v397_v3  ;;  %v318_v12 = vor.u32 %v400_v10, %v317_v9  ;;  %v322_v14 = vor.u32 %v399_v11, %v319_v13  ;;  %v418_v16 = vld [vmem:[%s592_s5 + $0x78] sm:$0xff]  ;;  %v409_v17 = vld [vmem:[%s592_s5 + $0x30] sm:$0xff]  ;;  %v408_v19 = vld [vmem:[%s592_s5 + $0x28] sm:$0xff]  ;;  %s297_s10 = sshll.u32 %s594_s7, 4  ;;  %s298_s10 = int_to_ptr.hbm [resolvable:$true] %s297_s10 }
   0x7   :  { %120 = vmatpush.bf16.msra.mxu2 %v330_v8  ;;  %276 = vmatpush.bf16.msra.mxu0 %v418_v16  ;;  %v417_v18 = vld [vmem:[%s592_s5 + $0x70] sm:$0xff]  ;;  %v416_v20 = vld [vmem:[%s592_s5 + $0x68] sm:$0xff]  ;;  %v407_v21 = vld [vmem:[%s592_s5 + $0x20] sm:$0xff] }
   0x8   :  { %264 = vmatpush.bf16.msra.mxu3 %v409_v17  ;;  %v415_v22 = vld [vmem:[%s592_s5 + $0x60] sm:$0xff]  ;;  %v406_v23 = vld [vmem:[%s592_s5 + $0x18] sm:$0xff]  ;;  %v405_v26 = vld [vmem:[%s592_s5 + $0x10] sm:$0xff] }
   0x9   :  { %314 = vmatmul.msk.bf16.vlgmr.msra.gmra.mxu1 %vm49_vm0, %v28_v5  ;;  %v414_v24 = vld [vmem:[%s592_s5 + $0x58] sm:$0xff]  ;;  %v420_v25 = vld [vmem:[%s589_s2] ss:$0 sm:$0xff]  ;;  %v404_v32 = vld [vmem:[%s592_s5 + $0x8] sm:$0xff] }
   0xa   :  { %107 = vmatpush.bf16.msrb.mxu1 %v326_v4  ;;  %v413_v33 = vld [vmem:[%s592_s5 + $0x50] sm:$0xff]  ;;  %v403_v34 = vld [vmem:[%s592_s5] sm:$0xff]  ;;  %v412_v35 = vld [vmem:[%s592_s5 + $0x48] sm:$0xff] }
   0xb   :  { %121 = vmatpush.bf16.msra.mxu2 %v322_v14  ;;  %277 = vmatpush.bf16.msra.mxu0 %v417_v18  ;;  %v411_v36 = vld [vmem:[%s592_s5 + $0x40] sm:$0xff] }
   0xc   :  { %265 = vmatpush.bf16.msra.mxu3 %v408_v19  ;;  %v72_v37 = vld [vmem:[%s591_s4] sm:$0x3]  ;;  %s450_s4 = smov [#allocation2]  }
   0xd   :  { %v74_v38 = vperm.slane %v72_v37, 0  ;;  %v75_v42 = vperm.slane %v72_v37, 1  ;;  %v421_v50 = vld [vmem:[%s593_s6] ss:$0 sm:$0xff]  ;;  %s295_s30 = sshll.u32 %s450_s4, 4  ;;  %s296_s30 = int_to_ptr.vmem [resolvable:$true] %s295_s30 }
   0xe   :  { %108 = vmatpush.bf16.msrb.mxu1 %v318_v12 }
   0xf   :  { %278 = vmatpush.bf16.msra.mxu0 %v416_v20 }
  0x10   :  { %266 = vmatpush.bf16.msra.mxu3 %v407_v21 }
  0x13   :  { %279 = vmatpush.bf16.msra.mxu0 %v415_v22 }
  0x14   :  { %267 = vmatpush.bf16.msra.mxu3 %v406_v23 }
  0x17   :  { %280 = vmatpush.bf16.msra.mxu0 %v414_v24 }
  0x18   :  { %268 = vmatpush.bf16.msra.mxu3 %v405_v26 }
  0x1b   :  { %281 = vmatpush.bf16.msra.mxu0 %v413_v33 }
  0x1c   :  { %269 = vmatpush.bf16.msra.mxu3 %v404_v32 }
  0x1f   :  { %282 = vmatpush.bf16.msra.mxu0 %v412_v35 }
  0x20   :  { %270 = vmatpush.bf16.msra.mxu3 %v403_v34 }
  0x23   :  { %283 = vmatpush.bf16.msra.mxu0 %v411_v36 }
  0x86   :  { %v62_v27 = vpop.f32.mrf.mxu1 }
  0x87   :  { %v63_v28 = vadd.f32 %v420_v25, %v62_v27 }
  0x89   :  { %422 = vtanh.f32 %v63_v28 }
  0x8e   :  { %v64_v29 = vpop.f32.mrf.mxu1 }
  0x8f   :  { %v423_v30 = vpop.eup %422 }
  0x90   :  { %v67_v31 = vpack.c.bf16 %v423_v30, %v423_v30 }
  0x92   :  { %331 = vmatmul.msk.bf16.vlgmr.msrb.gmra.mxu1 %vm49_vm0, %v67_v31  ;;  %332 = vmatmul.msk.bf16.vlgmr.msra.gmra.mxu2 %vm49_vm0, %v67_v31 }
 0x10f   :  { %v110_v39 = vpop.f32.mrf.mxu1 }
 0x110   :  { %v111_v40 = vadd.f32 %v110_v39, %v74_v38 }
 0x112   :  { %v127_v41 = vmax.f32 %v111_v40, 0.0 }
 0x114   :  { %v129_v43 = vpack.c.bf16 %v127_v41, %v127_v41 }
 0x115   :  { %v123_v44 = vpop.f32.mrf.mxu2 }
 0x116   :  { %v124_v45 = vadd.f32 %v123_v44, %v75_v42  ;;  %271 = vmatmul.bf16.vlgmr.msra.gmra.mxu3 %v129_v43 }
 0x117   :  { %v112_v46 = vpop.f32.mrf.mxu1 }
 0x118   :  { %v128_v47 = vmax.f32 %v124_v45, 0.0 }
 0x11a   :  { %v130_v48 = vpack.c.bf16 %v128_v47, %v128_v47 }
 0x11c   :  { %284 = vmatmul.bf16.vlgmr.msra.gmra.mxu0 %v130_v48 }
 0x11d   :  { %v125_v49 = vpop.f32.mrf.mxu2 }
 0x199   :  { %v272_v51 = vpop.f32.mrf.mxu3  ;;  %v285_v52 = vpop.f32.mrf.mxu0 }
 0x19a   :  { %v273_v53 = vadd.f32 %v421_v50, %v272_v51 }
 0x19c   :  { %v286_v54 = vadd.f32 %v285_v52, %v273_v53 }
 0x19e   :  { %289 = vst [vmem:[#allocation2] sm:$0x3] %v286_v54 }
 0x19f   :  { %300 = dma.vmem_to_hbm [thread:$0]  %s296_s30, 32, %s298_s10, [#allocation3]  }
 0x1a1   :  { %v274_v55 = vpop.f32.mrf.mxu3  ;;  %v287_v56 = vpop.f32.mrf.mxu0 }
 0x1a2   :  { %448 = dma.done.wait [#allocation3], 32  }
 0x1a3   :  { %449 = vsyncadd [#allocation3], 4294967264 }
 0x1a4   :  { %305 = vsyncpa [#allocation3], 1 }

// kernel: classification_albert_forward.6
= control target key start
LH: loop header
LB: loop body
LE: loop exit
PB: predicated region body
PF: predicated region fallthrough
CT: control target
= control target key end

     0   :  { %s1370_s29 = smov 0   ;;  %s1372_s30 = smov 0   ;;  %s1550_s0 = inlined_call_operand.vmem [shape: bf16[2,8,32], index: 0, kind: input, shape index: {}]   ;;  %s1551_s1 = inlined_call_operand.vmem [shape: f32[2,1,8], index: 1, kind: input, shape index: {}]   ;;  %s1552_s2 = inlined_call_operand.vmem [shape: bf16[32,96], index: 2, kind: input, shape index: {}]   ;;  %s1553_s3 = inlined_call_operand.vmem [shape: f32[1,96], index: 3, kind: input, shape index: {}]   ;;  %s1554_s4 = inlined_call_operand.vmem [shape: bf16[32,32], index: 4, kind: input, shape index: {}]   ;;  %s1555_s5 = inlined_call_operand.vmem [shape: f32[1,32], index: 5, kind: input, shape index: {}]   ;;  %s1556_s6 = inlined_call_operand.vmem [shape: f32[1,32], index: 6, kind: input, shape index: {}]   ;;  %s1557_s7 = inlined_call_operand.vmem [shape: f32[1,32], index: 7, kind: input, shape index: {}]   ;;  %s1558_s8 = inlined_call_operand.vmem [shape: bf16[32,64], index: 8, kind: input, shape index: {}]   ;;  %s1559_s9 = inlined_call_operand.vmem [shape: f32[1,64], index: 9, kind: input, shape index: {}]   ;;  %s1560_s10 = inlined_call_operand.vmem [shape: bf16[64,32], index: 10, kind: input, shape index: {}]   ;;  %s1561_s11 = inlined_call_operand.vmem [shape: f32[1,32], index: 11, kind: input, shape index: {}]   ;;  %s1562_s12 = inlined_call_operand.vmem [shape: f32[1,32], index: 12, kind: input, shape index: {}]   ;;  %s1563_s13 = inlined_call_operand.vmem [shape: f32[1,32], index: 13, kind: input, shape index: {}]   ;;  %s1564_s14 = inlined_call_operand.vmem [shape: bf16[2,1,32], index: 14, kind: output, shape index: {}]  }
   0x1   :  { %s1374_s15 = smov 0   ;;  %s1376_s16 = smov 0  }
   0x2   :  { %s1378_s17 = smov 0  }
   0x3 LB: > { %1566 = sst [smem:[#allocation4_spill]] %s1274_s16  ;;  %s33_s18 = sadd.s32 1, %s1270_s15  ;;  %s1278_s17 = sphi %s1378_s17, %s24_s17   ;;  %s1274_s16 = sphi %s1376_s16, %s1571_s16   ;;  %s1270_s15 = sphi %s1374_s15, %s1573_s15   ;;  %s1266_s30 = sphi %s1372_s30, %s1569_s30   ;;  %s1262_s29 = sphi %s1370_s29, %s1572_s29  }
   0x4   : > { %s36_s19 = sadd.s32 1, %s1274_s16  ;;  %p34_p0 = scmp.ge.s32.totalorder %s33_s18, 2 }
   0x5   : > { %p1084_p1 = scmp.ge.s32.totalorder %s1278_s17, 1  ;;  %p431_p2 = scmp.lt.s32.totalorder %s1278_s17, 5 }
   0x6   : > { %s1575_s18 = smov (%p34_p0, %s33_s18), 0  ;;  %s1577_s19 = smov (!%p34_p0, %s36_s19), %s1274_s16 }
   0x7   : > { %1567 = sst [smem:[#allocation5_spill]] %s1575_s18  ;;  %p432_p3 = pnand %p1084_p1, %p431_p2 }
   0x8   : > { %p38_p4 = scmp.ge.s32.totalorder %s1577_s19, 2  ;;  %p477_p5 = scmp.lt.s32.totalorder (!%p432_p3), %s1266_s30, 1 }
   0x9   : > { %435 = sbr.rel (%p432_p3) target bundleno = 1936 (0x790), region = 76  ;;  %p1086_p6 = scmp.ne.s32.totalorder (!%p432_p3), %s1262_s29, 0 }
   0xa   : > { %s1579_s19 = smov (%p38_p4, %s1577_s19), 0 }
   0xb   : > { %1568 = sst [smem:[#allocation6_spill]] %s1579_s19 }
   0xe   : > { %s1581_s30 = smov (!%p477_p5, %s1266_s30), 1  ;;  %491 = sbr.rel (%p1086_p6) target bundleno = 21 (0x15), region = 80 }
   0xf   : > { %s1085_s20 = sshll.u32 %s1581_s30, 2  ;;  %s483_s23 = scalar_lea.vmem %s1551_s1, %s1581_s30 }
  0x10   : > { %s480_s26 = scalar_lea.vmem %s1550_s0, %s1085_s20  ;;  %s1416_s19 = scalar_lea.vmem %s1564_s14, %s1581_s30 }
  0x13   : > { %v492_v0 = vld [vmem:[%s480_s26] sm:$0xf]  ;;  %vm493_vm0 = vcmask 257024  }
  0x14   : > { %494 = vst.msk [vmem:[#allocation2] sm:$0xf] %vm493_vm0, %v492_v0 }
  0x15 PF: > { %v1143_v1 = vld [vmem:[%s1552_s2 + $0x8] sm:$0xff]  ;;  %v1142_v2 = vld [vmem:[%s1552_s2] sm:$0xff]  ;;  %vm516_vm1 = vcmask 261120   ;;  %s1280_s16 = smov 104   ;;  %s1281_s18 = smov 120   ;;  %vm543_vm2 = vcmask 64512  }
  0x16   : > { %526 = vmatpush.bf16.msra.mxu0 %v1143_v1  ;;  %v1207_v4 = vld [vmem:[%s1553_s3] ss:$0 sm:$0xff]  ;;  %s1282_s25 = smov 96   ;;  %s1283_s26 = smov 80   ;;  %vm580_vm3 = vcmask 1043456   ;;  %vm598_vm4 = vcmask 60416  }
  0x17   : > { %s1284_s27 = smov 72   ;;  %s1285_s28 = smov 88   ;;  %v1208_v22 = vld [vmem:[%s483_s23] ss:$0 sm:$0xff]  ;;  %vm661_vm5 = vcmask 126016   ;;  %vm724_vm6 = vcmask 191616  }
  0x18   : > { %s1286_s21 = smov 112   ;;  %s1287_s30 = smov 64   ;;  %vm787_vm7 = vcmask 257216   ;;  %vm950_vm12 = vcmask 523264   ;;  %vm1001_vm0 = vcmask 257024  }
  0x19   : > { %s1288_s23 = smov 40   ;;  %s1289_s24 = smov 56  }
  0x1a   : > { %527 = vmatpush.bf16.msra.mxu0 %v1142_v2  ;;  %p1139_p7 = scmp.ne.s32.totalorder %s1262_s29, 1 }
  0x1b   : > { %v1425_v3 = vld [vmem:[#allocation2] sm:$0xf] }
  0x1d   : > { %1095 = vmatmul.msk.bf16.vlgmr.msra.gmra.mxu0 %vm516_vm1, %v1425_v3 }
  0x9a   : > { %v529_v5 = vpop.f32.mrf.mxu0 }
  0x9b   : > { %v530_v6 = vadd.f32 %v1207_v4, %v529_v5 }
  0x9d   : > { %v533_v7 = vpack.c.bf16 %v530_v6, %v530_v6 }
  0x9f   : > { %v539_v8 = vunpack.c.l.b16 %v533_v7 }
  0xa1   : > { %v1432_v9 = vpack.c.b16 %v539_v8, %v539_v8 }
  0xa2   : > { %v531_v10 = vpop.f32.mrf.mxu0 }
  0xa3   : > { %726 = vrot.lane.b32.xlu2 %v1432_v9, %s1280_s16  ;;  %600 = vrot.lane.b32.xlu1 %v1432_v9, %s1281_s18  ;;  %s1290_s16 = smov 48   ;;  %s1291_s18 = smov 8  }
  0xa4   : > { %541 = vrot.lane.b32.xlu0 %v1432_v9, %s1282_s25  ;;  %s1292_s25 = smov 16  }
  0xab   : > { %665 = vrot.lane.b32.xlu2 %v1432_v9, %s1283_s26  ;;  %728 = vrot.lane.b32.xlu1 %v1432_v9, %s1284_s27  ;;  %s1293_s26 = smov 24  }
  0xac   : > { %602 = vrot.lane.b32.xlu0 %v1432_v9, %s1285_s28 }
  0xb4   : > { %663 = vrot.lane.b32.xlu0 %v1432_v9, %s1286_s21 }
  0xfd   : > { %v727_v11 = vpop.permute.xlu2 %726 }
 0x105   : > { %v666_v12 = vpop.permute.xlu2 %665 }
 0x106   : > { %v671_v13 = vsel %vm543_vm2, %v666_v12, 0 }
 0x107   : > { %680 = vmatpush.bf16.xpose.msrb.mxu0 %v671_v13 }
 0x115   : > { %v601_v14 = vpop.permute.xlu1 %600 }
 0x116   : > { %v542_v15 = vpop.permute.xlu0 %541 }
 0x117   : > { %v548_v16 = vsel %vm543_vm2, %v542_v15, 0 }
 0x118   : > { %557 = vmatpush.bf16.xpose.msra.mxu1 %v548_v16 }
 0x11d   : > { %v729_v17 = vpop.permute.xlu1 %728 }
 0x11e   : > { %v603_v18 = vpop.permute.xlu0 %602  ;;  %v734_v19 = vsel %vm543_vm2, %v729_v17, 0 }
 0x11f   : > { %1096 = vmatmul.msk.bf16.vlgmr.msra.gmra.mxu1 %vm543_vm2, %v533_v7  ;;  %v608_v20 = vsel %vm543_vm2, %v603_v18, 0 }
 0x120   : > { %617 = vmatpush.bf16.xpose.msra.mxu3 %v608_v20 }
 0x126   : > { %v664_v21 = vpop.permute.xlu0 %663 }
 0x127   : > { %1098 = vmatmul.msk.bf16.vlgmr.msra.gmra.mxu3 %vm543_vm2, %v601_v14  ;;  %1100 = vmatmul.msk.bf16.vlgmr.msrb.gmra.mxu0 %vm543_vm2, %v664_v21 }
 0x128   : > { %743 = vmatpush.bf16.xpose.msrb.mxu3 %v734_v19 }
 0x137   : > { %1102 = vmatmul.msk.bf16.vlgmr.msrb.gmra.mxu3 %vm543_vm2, %v727_v11 }
 0x19c   : > { %v559_v23 = vpop.f32.mrf.mxu1 }
 0x19d   : > { %v560_v24 = vadd.f32 %v1208_v22, %v559_v23 }
 0x19f   : > { %v563_v25 = vsel %vm543_vm2, %v560_v24, -inf }
 0x1a0   : > { %564 = vmax.xlane.f32.xlu1 %v563_v25 }
 0x1a4   : > { %v561_v26 = vpop.f32.mrf.mxu1  ;;  %v682_v27 = vpop.f32.mrf.mxu0 }
 0x1a5   : > { %v683_v32 = vadd.f32 %v1208_v22, %v682_v27 }
 0x1a7   : > { %v686_v34 = vsel %vm543_vm2, %v683_v32, -inf }
 0x1aa   : > { %v619_v28 = vpop.f32.mrf.mxu3 }
 0x1ab   : > { %v620_v29 = vadd.f32 %v1208_v22, %v619_v28 }
 0x1ac   : > { %v684_v30 = vpop.f32.mrf.mxu0 }
 0x1ad   : > { %v623_v31 = vsel %vm543_vm2, %v620_v29, -inf }
 0x1ae   : > { %624 = vmax.xlane.f32.xlu2 %v623_v31 }
 0x1b2   : > { %v621_v33 = vpop.f32.mrf.mxu3 }
 0x1b3   : > { %v1144_v33 = vld [vmem:[%s1554_s4] sm:$0xff] }
 0x1b6   : > { %687 = vmax.xlane.f32.xlu2 %v686_v34 }
 0x1ba   : > { %v745_v35 = vpop.f32.mrf.mxu3 }
 0x1bb   : > { %v746_v36 = vadd.f32 %v1208_v22, %v745_v35 }
 0x1bd   : > { %v749_v37 = vsel %vm543_vm2, %v746_v36, -inf }
 0x1be   : > { %750 = vmax.xlane.f32.xlu0 %v749_v37 }
 0x1c2   : > { %v747_v38 = vpop.f32.mrf.mxu3 }
 0x1c3   : > { %v1209_v38 = vld [vmem:[%s1555_s5] ss:$0 sm:$0xff] }
 0x1ce   : > { %575 = vrot.lane.b32.xlu2 %v1432_v9, %s1287_s30 }
 0x1d6   : > { %761 = vrot.lane.b32.xlu2 %v1432_v9, %s1288_s23 }
 0x213   : > { %v565_v39 = vpop.xlane.xlu1 %564 }
 0x214   : > { %v566_v40 = vsub.f32 %v560_v24, %v565_v39  ;;  %v826_v39 = vunpack.c.l.bf16 %v1425_v3 }
 0x216   : > { %v567_v41 = vmul.f32 1.442695, %v566_v40 }
 0x218   : > { %1216 = vpow2.f32 %v567_v41 }
 0x21e   : > { %v1217_v42 = vpop.eup %1216 }
 0x21f   : > { %v569_v43 = vsel %vm543_vm2, %v1217_v42, 0.0 }
 0x220   : > { %570 = vadd.xlane.f32.xlu1 %v569_v43 }
 0x221   : > { %v625_v44 = vpop.xlane.xlu2 %624 }
 0x222   : > { %v626_v47 = vsub.f32 %v620_v29, %v625_v44 }
 0x224   : > { %v627_v49 = vmul.f32 1.442695, %v626_v47 }
 0x229   : > { %v688_v45 = vpop.xlane.xlu2 %687 }
 0x22a   : > { %v689_v46 = vsub.f32 %v683_v32, %v688_v45  ;;  %v1145_v32 = vld [vmem:[%s1554_s4 + $0x8] sm:$0xff]  ;;  %v1294_v45 = vmov 32.0  }
 0x22b   : > { %819 = vmatpush.bf16.msra.mxu0 %v1145_v32 }
 0x22c   : > { %v690_v48 = vmul.f32 1.442695, %v689_v46 }
 0x22e   : > { %1218 = vpow2.f32 %v690_v48 }
 0x22f   : > { %1220 = vpow2.f32 %v627_v49  ;;  %820 = vmatpush.bf16.msra.mxu0 %v1144_v33 }
 0x231   : > { %v576_v50 = vpop.permute.xlu2 %575  ;;  %v751_v51 = vpop.xlane.xlu0 %750 }
 0x232   : > { %v582_v52 = vsel %vm580_vm3, %v576_v50, 0  ;;  %v752_v54 = vsub.f32 %v746_v36, %v751_v51 }
 0x233   : > { %591 = vmatpush.bf16.msra.mxu2 %v582_v52 }
 0x234   : > { %v1219_v53 = vpop.eup %1218  ;;  %v753_v56 = vmul.f32 1.442695, %v752_v54 }
 0x235   : > { %v692_v55 = vsel %vm543_vm2, %v1219_v53, 0.0  ;;  %v1221_v57 = vpop.eup %1220 }
 0x236   : > { %693 = vadd.xlane.f32.xlu0 %v692_v55  ;;  %1222 = vpow2.f32 %v753_v56  ;;  %v629_v58 = vsel %vm543_vm2, %v1221_v57, 0.0  ;;  %v1147_v56 = vld [vmem:[%s1558_s8 + $0x8] sm:$0xff] }
 0x239   : > { %635 = vrot.lane.b32.xlu1 %v1432_v9, %s1289_s24  ;;  %v762_v2 = vpop.permute.xlu2 %761 }
 0x23a   : > { %v767_v6 = vsel %vm580_vm3, %v762_v2, 0 }
 0x23c   : > { %v1223_v59 = vpop.eup %1222 }
 0x23d   : > { %v755_v60 = vsel %vm543_vm2, %v1223_v59, 0.0 }
 0x23e   : > { %630 = vadd.xlane.f32.xlu0 %v629_v58 }
 0x246   : > { %756 = vadd.xlane.f32.xlu0 %v755_v60 }
 0x25a   : > { %698 = vrot.lane.b32.xlu0 %v1432_v9, %s1290_s16 }
 0x293   : > { %v571_v61 = vpop.xlane.xlu1 %570 }
 0x294   : > { %1224 = vrcp.f32 %v571_v61 }
 0x29a   : > { %v1225_v62 = vpop.eup %1224 }
 0x29b   : > { %v573_v63 = vmul.f32 %v1225_v62, %v1217_v42 }
 0x29d   : > { %v574_v0 = vpack.c.bf16 %v573_v63, %v573_v63 }
 0x29f   : > { %1097 = vmatmul.msk.bf16.vlgmr.msra.gmra.mxu2 %vm543_vm2, %v574_v0 }
 0x2a9   : > { %v694_v1 = vpop.xlane.xlu0 %693 }
 0x2ab   : > { %v636_v4 = vpop.permute.xlu1 %635 }
 0x2ac   : > { %v641_v5 = vsel %vm580_vm3, %v636_v4, 0  ;;  %v1210_v4 = vld [vmem:[%s1556_s6] ss:$0 sm:$0xff] }
 0x2ad   : > { %650 = vmatpush.bf16.msrb.mxu2 %v641_v5 }
 0x2b1   : > { %776 = vmatpush.bf16.msra.mxu2 %v767_v6  ;;  %v631_v7 = vpop.xlane.xlu0 %630  ;;  %v1211_v6 = vld [vmem:[%s1557_s7] ss:$0 sm:$0xff] }
 0x2b2   : > { %1226 = vrcp.f32 %v631_v7 }
 0x2b8   : > { %v1227_v8 = vpop.eup %1226 }
 0x2b9   : > { %v633_v9 = vmul.f32 %v1227_v8, %v1221_v57  ;;  %v757_v10 = vpop.xlane.xlu0 %756  ;;  %v1146_v57 = vld [vmem:[%s1558_s8] sm:$0xff] }
 0x2ba   : > { %1228 = vrcp.f32 %v757_v10 }
 0x2bb   : > { %v634_v11 = vpack.c.bf16 %v633_v9, %v633_v9  ;;  %1230 = vrcp.f32 %v694_v1 }
 0x2bc   : > { %1232 = vrcp.f32 %v1294_v45 }
 0x2bd   : > { %1099 = vmatmul.msk.bf16.vlgmr.msrb.gmra.mxu2 %vm543_vm2, %v634_v11  ;;  %v1151_v11 = vld [vmem:[%s1560_s10 + $0x18] sm:$0xff] }
 0x2be   : > { %958 = vmatpush.bf16.msra.mxu3 %v1151_v11 }
 0x2c0   : > { %v1229_v12 = vpop.eup %1228 }
 0x2c1   : > { %v759_v13 = vmul.f32 %v1229_v12, %v1223_v59  ;;  %v1231_v14 = vpop.eup %1230  ;;  %v1150_v12 = vld [vmem:[%s1560_s10 + $0x10] sm:$0xff] }
 0x2c2   : > { %v696_v15 = vmul.f32 %v1231_v14, %v1219_v53  ;;  %v1233_v46 = vpop.eup %1232  ;;  %959 = vmatpush.bf16.msra.mxu3 %v1150_v12  ;;  %v1148_v14 = vld [vmem:[%s1560_s10] sm:$0xff] }
 0x2c3   : > { %v760_v16 = vpack.c.bf16 %v759_v13, %v759_v13  ;;  %v834_v47 = vmul.f32 32.0, %v1233_v46  ;;  %vm838_vm8 = vweird.f32 %v1233_v46  ;;  %v1149_v13 = vld [vmem:[%s1560_s10 + $0x8] sm:$0xff] }
 0x2c4   : > { %v697_v19 = vpack.c.bf16 %v696_v15, %v696_v15  ;;  %v1212_v15 = vld [vmem:[%s1559_s9] ss:$0 sm:$0xff] }
 0x2c5   : > { %v835_v48 = vsub.f32 1.0, %v834_v47 }
 0x2c6   : > { %960 = vmatpush.bf16.msra.mxu3 %v1149_v13 }
 0x2c7   : > { %v836_v49 = vmul.f32 %v1233_v46, %v835_v48 }
 0x2c9   : > { %v837_v50 = vadd.f32 %v1233_v46, %v836_v49  ;;  %v1214_v49 = vld [vmem:[%s1562_s12] ss:$0 sm:$0xff] }
 0x2ca   : > { %961 = vmatpush.bf16.msra.mxu3 %v1148_v14 }
 0x2cb   : > { %v1486_v51 = vsel %vm838_vm8, %v1233_v46, %v837_v50 }
 0x2cc   : > { %v699_v17 = vpop.permute.xlu0 %698 }
 0x2cd   : > { %1103 = vmatmul.msk.bf16.vlgmr.msra.gmra.mxu2 %vm543_vm2, %v760_v16  ;;  %v704_v18 = vsel %vm580_vm3, %v699_v17, 0 }
 0x2ce   : > { %713 = vmatpush.bf16.msrb.mxu1 %v704_v18 }
 0x2d1   : > { %1101 = vmatmul.msk.bf16.vlgmr.msrb.gmra.mxu1 %vm543_vm2, %v697_v19 }
 0x2d2   : > { %897 = vmatpush.bf16.msra.mxu1 %v1147_v56 }
 0x2d6   : > { %898 = vmatpush.bf16.msra.mxu1 %v1146_v57 }
 0x322   : > { %v593_v20 = vpop.f32.mrf.mxu2 }
 0x323   : > { %v597_v21 = vpack.c.bf16 %v593_v20, %v593_v20 }
 0x325   : > { %599 = vst.msk [vmem:[#allocation3] sm:$0xf] %vm598_vm4, %v597_v21 }
 0x32a   : > { %v595_v22 = vpop.f32.mrf.mxu2 }
 0x340   : > { %v652_v23 = vpop.f32.mrf.mxu2 }
 0x341   : > { %v656_v24 = vpack.c.bf16 %v652_v23, %v652_v23 }
 0x343   : > { %658 = vrot.lane.b32.xlu1 %v656_v24, %s1291_s18 }
 0x348   : > { %v654_v25 = vpop.f32.mrf.mxu2 }
 0x34e   : > { %v715_v26 = vpop.f32.mrf.mxu1 }
 0x34f   : > { %v719_v27 = vpack.c.bf16 %v715_v26, %v715_v26 }
 0x350   : > { %v778_v28 = vpop.f32.mrf.mxu2 }
 0x351   : > { %v782_v29 = vpack.c.bf16 %v778_v28, %v778_v28  ;;  %721 = vrot.lane.b32.xlu2 %v719_v27, %s1292_s25 }
 0x353   : > { %784 = vrot.lane.b32.xlu1 %v782_v29, %s1293_s26  ;;  %v1213_v29 = vld [vmem:[%s1561_s11] ss:$0 sm:$0xff] }
 0x356   : > { %v717_v30 = vpop.f32.mrf.mxu1 }
 0x358   : > { %v780_v31 = vpop.f32.mrf.mxu2 }
 0x3ab   : > { %v722_v35 = vpop.permute.xlu2 %721 }
 0x3b5   : > { %v659_v34 = vpop.permute.xlu1 %658 }
 0x3b6   : > { %662 = vst.msk [vmem:[#allocation3] sm:$0xf] %vm661_vm5, %v659_v34 }
 0x3b7   : > { %725 = vst.msk [vmem:[#allocation3] sm:$0xf] %vm724_vm6, %v722_v35 }
 0x3c5   : > { %v785_v36 = vpop.permute.xlu1 %784 }
 0x3c6   : > { %788 = vst.msk [vmem:[#allocation3] sm:$0xf] %vm787_vm7, %v785_v36 }
 0x3cd   : > { %v789_v37 = vld [vmem:[#allocation3] sm:$0xf] }
 0x3ce   : > { %1112 = vmatmul.msk.bf16.vlgmr.msra.gmra.mxu0 %vm516_vm1, %v789_v37 }
 0x44b   : > { %v822_v40 = vpop.f32.mrf.mxu0 }
 0x44c   : > { %v823_v41 = vadd.f32 %v1209_v38, %v822_v40 }
 0x44e   : > { %v827_v42 = vadd.f32 %v826_v39, %v823_v41 }
 0x450   : > { %v830_v43 = vsel %vm516_vm1, %v827_v42, 0.0 }
 0x451   : > { %831 = vadd.xlane.f32.xlu2 %v830_v43 }
 0x453   : > { %v824_v44 = vpop.f32.mrf.mxu0 }
 0x4c4   : > { %v832_v52 = vpop.xlane.xlu2 %831 }
 0x4c5   : > { %v840_v3 = vmul.f32 %v1486_v51, %v832_v52 }
 0x4c7   : > { %v841_v53 = vsub.f32 %v827_v42, %v840_v3 }
 0x4c9   : > { %v842_v54 = vmul.f32 %v841_v53, %v841_v53 }
 0x4cb   : > { %v843_v55 = vsel %vm516_vm1, %v842_v54, 0.0 }
 0x4cc   : > { %844 = vadd.xlane.f32.xlu1 %v843_v55 }
 0x53f   : > { %v845_v58 = vpop.xlane.xlu1 %844 }
 0x540   : > { %v846_v59 = vmul.f32 %v845_v58, %v1486_v51 }
 0x542   : > { %v847_v60 = vadd.f32 1e-12, %v846_v59 }
 0x544   : > { %1234 = vrsqrt.f32 %v847_v60  ;;  %vm854_vm10 = vweird.f32 %v847_v60 }
 0x54a   : > { %v1235_v61 = vpop.eup %1234 }
 0x54b   : > { %v849_v62 = vmul.f32 %v1235_v61, %v847_v60  ;;  %vm855_vm9 = vweird.f32 %v1235_v61 }
 0x54c   : > { %vm856_vm11 = vmor %vm854_vm10, %vm855_vm9 }
 0x54d   : > { %v850_v63 = vmul.f32 %v1235_v61, %v849_v62 }
 0x54f   : > { %v851_v0 = vmul.f32 0.5, %v850_v63 }
 0x551   : > { %v852_v1 = vsub.f32 1.5, %v851_v0 }
 0x553   : > { %v853_v2 = vmul.f32 %v1235_v61, %v852_v1 }
 0x555   : > { %v857_v5 = vsel %vm856_vm11, %v1235_v61, %v853_v2 }
 0x556   : > { %v858_v7 = vmul.f32 %v857_v5, %v841_v53 }
 0x558   : > { %v862_v8 = vmul.f32 %v1210_v4, %v858_v7 }
 0x55a   : > { %v866_v9 = vadd.f32 %v1211_v6, %v862_v8 }
 0x55c   : > { %v867_v10 = vpack.c.bf16 %v866_v9, %v866_v9 }
 0x55e   : > { %1121 = vmatmul.msk.bf16.vlgmr.msra.gmra.mxu1 %vm516_vm1, %v867_v10 }
 0x5db   : > { %v900_v16 = vpop.f32.mrf.mxu1 }
 0x5dc   : > { %v901_v17 = vadd.f32 %v1212_v15, %v900_v16 }
 0x5de   : > { %v905_v18 = vmul.f32 0.044715, %v901_v17  ;;  %v904_v25 = vmul.f32 0.5, %v901_v17 }
 0x5e0   : > { %v906_v19 = vmul.f32 %v905_v18, %v901_v17 }
 0x5e2   : > { %v907_v20 = vmul.f32 %v906_v19, %v901_v17 }
 0x5e3   : > { %v902_v21 = vpop.f32.mrf.mxu1 }
 0x5e4   : > { %v908_v22 = vadd.f32 %v907_v20, %v901_v17 }
 0x5e6   : > { %v909_v23 = vmul.f32 0.7978846, %v908_v22 }
 0x5e8   : > { %1236 = vtanh.f32 %v909_v23 }
 0x5ee   : > { %v1237_v24 = vpop.eup %1236 }
 0x5ef   : > { %v911_v26 = vadd.f32 1.0, %v1237_v24 }
 0x5f1   : > { %v912_v27 = vmul.f32 %v911_v26, %v904_v25 }
 0x5f3   : > { %v913_v28 = vpack.c.bf16 %v912_v27, %v912_v27 }
 0x5f5   : > { %1138 = vmatmul.msk.bf16.vlgmr.msra.gmra.mxu3 %vm950_vm12, %v913_v28 }
 0x678   : > { %v963_v30 = vpop.f32.mrf.mxu3 }
 0x679   : > { %v964_v31 = vadd.f32 %v1213_v29, %v963_v30 }
 0x67b   : > { %v967_v32 = vadd.f32 %v964_v31, %v866_v9 }
 0x67d   : > { %v970_v33 = vsel %vm516_vm1, %v967_v32, 0.0 }
 0x67e   : > { %971 = vadd.xlane.f32.xlu0 %v970_v33 }
 0x680   : > { %v965_v34 = vpop.f32.mrf.mxu3 }
 0x6f1   : > { %v972_v35 = vpop.xlane.xlu0 %971 }
 0x6f2   : > { %v973_v36 = vmul.f32 %v972_v35, %v1486_v51 }
 0x6f4   : > { %v974_v37 = vsub.f32 %v967_v32, %v973_v36 }
 0x6f6   : > { %v975_v38 = vmul.f32 %v974_v37, %v974_v37 }
 0x6f8   : > { %v976_v39 = vsel %vm516_vm1, %v975_v38, 0.0 }
 0x6f9   : > { %977 = vadd.xlane.f32.xlu2 %v976_v39 }
 0x76c   : > { %v978_v40 = vpop.xlane.xlu2 %977 }
 0x76d   : > { %v979_v41 = vmul.f32 %v978_v40, %v1486_v51  ;;  %v1215_v51 = vld [vmem:[%s1563_s13] ss:$0 sm:$0xff] }
 0x76f   : > { %v980_v42 = vadd.f32 1e-12, %v979_v41 }
 0x771   : > { %1238 = vrsqrt.f32 %v980_v42  ;;  %vm987_vm14 = vweird.f32 %v980_v42 }
 0x777   : > { %v1239_v43 = vpop.eup %1238 }
 0x778   : > { %v982_v44 = vmul.f32 %v1239_v43, %v980_v42  ;;  %vm988_vm13 = vweird.f32 %v1239_v43 }
 0x779   : > { %vm989_vm15 = vmor %vm987_vm14, %vm988_vm13 }
 0x77a   : > { %v983_v45 = vmul.f32 %v1239_v43, %v982_v44 }
 0x77c   : > { %v984_v46 = vmul.f32 0.5, %v983_v45 }
 0x77e   : > { %v985_v47 = vsub.f32 1.5, %v984_v46 }
 0x780   : > { %v986_v48 = vmul.f32 %v1239_v43, %v985_v47 }
 0x782   : > { %v990_v50 = vsel %vm989_vm15, %v1239_v43, %v986_v48 }
 0x783   : > { %v991_v52 = vmul.f32 %v990_v50, %v974_v37 }
 0x785   : > { %v995_v3 = vmul.f32 %v1214_v49, %v991_v52 }
 0x787   : > { %v999_v53 = vadd.f32 %v1215_v51, %v995_v3  ;;  %1006 = sbr.rel (%p1139_p7) target bundleno = 1936 (0x790), region = 84 }
 0x789   : > { %v1000_v54 = vpack.c.bf16 %v999_v53, %v999_v53 }
 0x78b   : > { %1002 = vst.msk [vmem:[#allocation2] sm:$0xf] %vm1001_vm0, %v1000_v54 }
 0x78c   : > { %vm1007_vm1 = vcmask 253952   ;;  %vm1008_vm2 = vsmask.f32 256  ;;  %v1010_v55 = vld [vmem:[%s1416_s19] sm:$0x1] }
 0x78d   : > { %vm1009_vm3 = vmand %vm1007_vm1, %vm1008_vm2 }
 0x78e   : > { %v1011_v56 = vsel %vm1009_vm3, %v1000_v54, %v1010_v55 }
 0x78f   : > { %1012 = vst [vmem:[%s1416_s19] sm:$0x1] %v1011_v56 }
 0x790 PF: > { %s24_s17 = sadd.s32 1, %s1278_s17   ;;  %s1569_s30 = sld [smem:[#allocation4_spill]] }
 0x791   : > { %p21_p8 = scmp.ge.s32.totalorder %s24_s17, 6   ;;  %s1570_s23 = sld [smem:[#allocation5_spill]] }
 0x792   : > { %s1571_s16 = sld [smem:[#allocation6_spill]]  ;;  %s1572_s29 = smov %s1270_s15 }
 0x793   :  { %23 = sbr.rel (!%p21_p8) target bundleno = 3 (0x3), region = 117 }
 0x797   : > { %s1573_s15 = smov %s1570_s23 }

</bundles_post_ra>
